<compile_context>
chip_gen: v7x
topology: tpu7x:2x2x1
jax: 0.10.0
libtpu: 0.0.40
codegen_flags: <defaults>
</compile_context>

<pallas_src>
import functools

import jax
import jax.numpy as jnp
from jax import lax
from jax.experimental import pallas as pl
from jax.experimental.pallas import tpu as pltpu


# ----------------------------- pooling kernel ------------------------------

def _pool_kernel(x_ref, o_ref, acc_ref, *, hw_total, t_hw, chunk, n_chunks,
                 need_mask):
    """x_ref: (1, C, t_hw) tile of one batch element.
    acc_ref: (C, chunk) running max.  o_ref: (1, C, 1) pooled column."""
    hw_id = pl.program_id(1)
    last = pl.num_programs(1) - 1

    @pl.when(hw_id == 0)
    def _init():
        acc_ref[...] = jnp.full(acc_ref.shape, -jnp.inf, acc_ref.dtype)

    def _accumulate(masked):
        m = acc_ref[...]                                   # (C, chunk)
        if masked:
            lane = lax.broadcasted_iota(jnp.int32, (acc_ref.shape[0], chunk), 1)
            rem = hw_total - hw_id * t_hw                  # valid cols left
        for j in range(n_chunks):                          # static unroll
            v = x_ref[0, :, j * chunk:(j + 1) * chunk]     # (C, chunk)
            if masked:
                v = jnp.where(lane < (rem - j * chunk), v, -jnp.inf)
            m = jnp.maximum(m, v)                          # VPU only
        acc_ref[...] = m

    if need_mask:
        # Only the (single) last HW tile can contain out-of-bounds garbage.
        @pl.when(hw_id == last)
        def _masked():
            _accumulate(True)

        @pl.when(hw_id != last)
        def _unmasked():
            _accumulate(False)
    else:
        _accumulate(False)

    @pl.when(hw_id == last)
    def _finish():
        # Single cross-lane reduce per batch element -> (C, 1) pooled column.
        o_ref[0] = jnp.max(acc_ref[...], axis=-1, keepdims=True)


# ------------------------------- MLP kernel --------------------------------

def _mlp_kernel(p_ref, w1_ref, b1_ref, w2_ref, b2_ref, o_ref):
    """Column-major MLP with PyTorch-layout (out, in) weights -> no transposes.
    p_ref: (C, tb) pooled columns; o_ref: (n_out, tb)."""
    h = jnp.dot(w1_ref[...], p_ref[...], preferred_element_type=jnp.float32)
    h = jnp.maximum(h + b1_ref[...], 0.0)                  # (1024, tb)
    out = jnp.dot(w2_ref[...], h, preferred_element_type=jnp.float32)
    o_ref[...] = (out + b2_ref[...]).astype(o_ref.dtype)   # (128, tb)


# --------------------------------- wrapper ---------------------------------

def projection_unet_mlp(x_nchw, w1, b1, w2, b2):
    """x_nchw: (B, C, H, W) f32.  w1:(1024,1024), b1:(1024,), w2:(128,1024),
    b2:(128,) in native PyTorch Linear layout (out_features, in_features).
    Returns (B, 128)."""
    B, C, H, W = x_nchw.shape
    HW = H * W
    n_out = w2.shape[0]
    x = x_nchw.reshape(B, C, HW)          # free reshape of contiguous NCHW
    b1c = b1.reshape(-1, 1)               # (1024, 1)
    b2c = b2.reshape(-1, 1)               # (128, 1)

    # Generation-aware sizing: v5e/v6e have 128 MiB VMEM, v7x only 64 MiB.
    try:
        vmem_bytes = pltpu.get_tpu_info().vmem_capacity_bytes
    except Exception:
        vmem_bytes = 64 << 20
    big_vmem = vmem_bytes >= (100 << 20)
    t_target = 4096 if big_vmem else 2048          # HW columns per x tile

    if HW < 128:
        t_hw, chunk = HW, HW                       # single full-width block
        need_mask = False
    else:
        chunk = 128
        t_hw = min(t_target, (HW // 128) * 128)    # lane-aligned tile width
        need_mask = (HW % t_hw) != 0               # garbage only in last tile
    n_chunks = t_hw // chunk
    n_hw_tiles = pl.cdiv(HW, t_hw)

    pool_kernel = functools.partial(
        _pool_kernel, hw_total=HW, t_hw=t_hw, chunk=chunk,
        n_chunks=n_chunks, need_mask=need_mask)

    # ---- Kernel 1: global max-pool over H*W, per (batch, channel) ----
    pooled = pl.pallas_call(
        pool_kernel,
        out_shape=jax.ShapeDtypeStruct((B, C, 1), jnp.float32),
        grid=(B, n_hw_tiles),
        in_specs=[pl.BlockSpec((1, C, t_hw), lambda b, hw: (b, 0, hw))],
        out_specs=pl.BlockSpec((1, C, 1), lambda b, hw: (b, 0, 0)),
        scratch_shapes=[pltpu.VMEM((C, chunk), jnp.float32)],   # running max
        compiler_params=pltpu.CompilerParams(
            dimension_semantics=("parallel", "arbitrary"),
            vmem_limit_bytes=(56 << 20) if big_vmem else (28 << 20)),
    )(x)

    # Tiny activation transpose (B*C*4 bytes) so the MLP stays column-major.
    pooled_cols = pooled.reshape(B, C).T                    # (C, B)

    # ---- Kernel 2: one batched MLP over all pooled columns ----
    tb = B if B <= 512 else 512                             # 128-aligned if tiled
    n_b_tiles = pl.cdiv(B, tb)
    out_cols = pl.pallas_call(
        _mlp_kernel,
        out_shape=jax.ShapeDtypeStruct((n_out, B), jnp.float32),
        grid=(n_b_tiles,),
        in_specs=[
            pl.BlockSpec((C, tb), lambda i: (0, i)),        # pooled columns
            pl.BlockSpec(w1.shape, lambda i: (0, 0)),       # resident weights
            pl.BlockSpec(b1c.shape, lambda i: (0, 0)),
            pl.BlockSpec(w2.shape, lambda i: (0, 0)),
            pl.BlockSpec(b2c.shape, lambda i: (0, 0)),
        ],
        out_specs=pl.BlockSpec((n_out, tb), lambda i: (0, i)),
        compiler_params=pltpu.CompilerParams(
            dimension_semantics=("parallel",),
            vmem_limit_bytes=32 << 20),
    )(pooled_cols, w1, b1c, w2, b2c)

    return out_cols.T                                       # (B, 128)


if __name__ == "__main__":
    key = jax.random.PRNGKey(0)
    k_x, k1, k2, k3, k4 = jax.random.split(key, 5)

    # Small but shape-consistent input: C must be 1024 (Linear in-features).
    B, C, H, W = 2, 1024, 4, 4
    x = jax.random.normal(k_x, (B, C, H, W), jnp.float32)

    n_ch, n_out = 1024, 128
    bound = 1.0 / jnp.sqrt(n_ch)
    # Native PyTorch Linear layout: weight (out_features, in_features), bias (out,)
    w1 = jax.random.uniform(k1, (n_ch, n_ch), jnp.float32, -bound, bound)
    b1 = jax.random.uniform(k2, (n_ch,), jnp.float32, -bound, bound)
    w2 = jax.random.uniform(k3, (n_out, n_ch), jnp.float32, -bound, bound)
    b2 = jax.random.uniform(k4, (n_out,), jnp.float32, -bound, bound)

    out = projection_unet_mlp(x, w1, b1, w2, b2)
    out = jax.block_until_ready(out)
    assert out.shape == (B, n_out)

    # Pure-JAX reference (same math as the PyTorch forward), high-precision dots.
    hp = jax.lax.Precision.HIGHEST
    pooled_ref = jnp.max(x.reshape(B, C, H * W), axis=-1)          # (B, 1024)
    h_ref = jnp.maximum(jnp.dot(pooled_ref, w1.T, precision=hp) + b1, 0.0)
    ref = jnp.dot(h_ref, w2.T, precision=hp) + b2
    assert jnp.allclose(out, ref, atol=2e-2, rtol=2e-2), "mismatch vs JAX reference"

    print("KERNEL_OK")
</pallas_src>

<mosaic_0001>
module attributes {stable_mosaic.version = 11 : i64} {
  func.func @_pool_kernel(%arg0: i32, %arg1: i32, %arg2: memref<1x1024x16xf32, #tpu.memory_space<vmem>>, %arg3: memref<1x1024x1xf32, #tpu.memory_space<vmem>>, %arg4: memref<1024x16xf32, #tpu.memory_space<vmem>>) attributes {dimension_semantics = [#tpu.dimension_semantics<parallel>, #tpu.dimension_semantics<arbitrary>], iteration_bounds = array<i64: 2, 1>, scalar_prefetch = 0 : i64, scratch_operands = 1 : i64, tpu.core_type = #tpu.core_type<tc>, window_params = [{transform_indices = @transform_0, window_bounds = array<i64: 1, 1024, 16>}, {transform_indices = @transform_1, window_bounds = array<i64: 1, 1024, 1>}]} {
    %c0_i32 = arith.constant 0 : i32
    %0 = arith.cmpi eq, %arg1, %c0_i32 : i32
    %1 = arith.extui %0 : i1 to i32
    %c0_i32_0 = arith.constant 0 : i32
    %2 = arith.cmpi ne, %1, %c0_i32_0 : i32
    scf.if %2 {
      %cst = arith.constant 0xFF800000 : f32
      %11 = vector.broadcast %cst : f32 to vector<1024x16xf32>
      %c0_9 = arith.constant 0 : index
      %c0_10 = arith.constant 0 : index
      %12 = vector.load %arg4[%c0_9, %c0_10] : memref<1024x16xf32, #tpu.memory_space<vmem>>, vector<1024x16xf32>
      tpu.vector_store %arg4[%c0_9, %c0_10], %11 {strides = array<i32>} : memref<1024x16xf32, #tpu.memory_space<vmem>>, vector<1024x16xf32>,
    } else {
    }
    %c0 = arith.constant 0 : index
    %c0_1 = arith.constant 0 : index
    %3 = vector.load %arg4[%c0, %c0_1] : memref<1024x16xf32, #tpu.memory_space<vmem>>, vector<1024x16xf32>
    %c0_2 = arith.constant 0 : index
    %c0_3 = arith.constant 0 : index
    %c0_4 = arith.constant 0 : index
    %4 = vector.load %arg2[%c0_2, %c0_3, %c0_4] : memref<1x1024x16xf32, #tpu.memory_space<vmem>>, vector<1x1024x16xf32>
    %5 = vector.shape_cast %4 : vector<1x1024x16xf32> to vector<1024x16xf32>
    %6 = arith.maximumf %3, %5 : vector<1024x16xf32>
    %c0_5 = arith.constant 0 : index
    %c0_6 = arith.constant 0 : index
    %7 = vector.load %arg4[%c0_5, %c0_6] : memref<1024x16xf32, #tpu.memory_space<vmem>>, vector<1024x16xf32>
    tpu.vector_store %arg4[%c0_5, %c0_6], %6 {strides = array<i32>} : memref<1024x16xf32, #tpu.memory_space<vmem>>, vector<1024x16xf32>,
    %c0_i32_7 = arith.constant 0 : i32
    %8 = arith.cmpi eq, %arg1, %c0_i32_7 : i32
    %9 = arith.extui %8 : i1 to i32
    %c0_i32_8 = arith.constant 0 : i32
    %10 = arith.cmpi ne, %9, %c0_i32_8 : i32
    scf.if %10 {
      %c0_9 = arith.constant 0 : index
      %c0_10 = arith.constant 0 : index
      %11 = vector.load %arg4[%c0_9, %c0_10] : memref<1024x16xf32, #tpu.memory_space<vmem>>, vector<1024x16xf32>
      %cst = arith.constant dense<0xFF800000> : vector<1024xf32>
      %12 = vector.multi_reduction <maximumf>, %11, %cst [1] : vector<1024x16xf32> to vector<1024xf32>
      %13 = vector.shape_cast %12 : vector<1024xf32> to vector<1024x1xf32>
      %c0_11 = arith.constant 0 : index
      %c0_12 = arith.constant 0 : index
      %c0_13 = arith.constant 0 : index
      %14 = vector.load %arg3[%c0_11, %c0_12, %c0_13] : memref<1x1024x1xf32, #tpu.memory_space<vmem>>, vector<1x1024x1xf32>
      %15 = vector.shape_cast %14 : vector<1x1024x1xf32> to vector<1024x1xf32>
      %16 = vector.shape_cast %13 : vector<1024x1xf32> to vector<1x1024x1xf32>
      tpu.vector_store %arg3[%c0_11, %c0_12, %c0_13], %16 {strides = array<i32>} : memref<1x1024x1xf32, #tpu.memory_space<vmem>>, vector<1x1024x1xf32>,
    } else {
    }
    return
  }
  func.func @transform_0(%arg0: i32, %arg1: i32) -> (i32, i32, i32) {
    %c0_i32 = arith.constant 0 : i32
    %c0_i32_0 = arith.constant 0 : i32
    return %arg0, %c0_i32, %arg1 : i32, i32, i32
  }
  func.func @transform_1(%arg0: i32, %arg1: i32) -> (i32, i32, i32) {
    %c0_i32 = arith.constant 0 : i32
    %c0_i32_0 = arith.constant 0 : i32
    %c0_i32_1 = arith.constant 0 : i32
    return %arg0, %c0_i32, %c0_i32_0 : i32, i32, i32
  }
}

</mosaic_0001>

<bundles_post_ra>
// kernel: tpu_custom_call.1
= control target key start
LH: loop header
LB: loop body
LE: loop exit
PB: predicated region body
PF: predicated region fallthrough
CT: control target
= control target key end

     0   :  { %s1572_s6 = smov 0   ;;  %s1574_s7 = smov 0   ;;  %s2518_s0 = inlined_call_operand.vmem [shape: f32[2,1024,16], index: 0, kind: input, shape index: {}]   ;;  %s2519_s1 = inlined_call_operand.vmem [shape: f32[2,1024,1], index: 1, kind: output, shape index: {}]  }
   0x1   :  { %s1576_s8 = smov 0  }
   0x2 LB: > { %s23_s9 = sadd.s32 1, %s1555_s7  ;;  %p1503_p0 = scmp.ge.s32.totalorder %s1559_s8, 1  ;;  %s1559_s8 = sphi %s1576_s8, %s11_s8   ;;  %s1555_s7 = sphi %s1574_s7, %s2521_s7   ;;  %s1551_s6 = sphi %s1572_s6, %s2520_s6  }
   0x3   : > { %p25_p1 = scmp.ge.s32.totalorder %s23_s9, 2  ;;  %p104_p2 = scmp.lt.s32.totalorder %s1559_s8, 3 }
   0x5   : > { %s2523_s9 = smov (%p25_p1, %s23_s9), 0  ;;  %p105_p3 = pnand %p1503_p0, %p104_p2 }
   0x6   : > { %p127_p4 = scmp.lt.s32.totalorder (!%p105_p3), %s1551_s6, 1  ;;  %vm144_vm0 = vcmask (!%p105_p3), 130048   ;;  %v1561_v0 = vmov (!%p105_p3), -inf   ;;  %vm1301_vm1 = vcmask (!%p105_p3), 7168  }
   0x7   : > { %108 = sbr.rel (%p105_p3) target bundleno = 475 (0x1db), region = 24  ;;  %147 = vst.msk [vmem:[#allocation2 + $0x10] sm:$0xff] (!%p105_p3), %vm144_vm0, %v1561_v0  ;;  %145 = vst.msk [vmem:[#allocation2] sm:$0xff] (!%p105_p3), %vm144_vm0, %v1561_v0 }
   0x8   : > { %146 = vst.msk [vmem:[#allocation2 + $0x8] sm:$0xff] (!%p105_p3), %vm144_vm0, %v1561_v0  ;;  %148 = vst.msk [vmem:[#allocation2 + $0x18] sm:$0xff] (!%p105_p3), %vm144_vm0, %v1561_v0 }
   0x9   : > { %149 = vst.msk [vmem:[#allocation2 + $0x20] sm:$0xff] (!%p105_p3), %vm144_vm0, %v1561_v0  ;;  %150 = vst.msk [vmem:[#allocation2 + $0x28] sm:$0xff] (!%p105_p3), %vm144_vm0, %v1561_v0 }
   0xa   : > { %151 = vst.msk [vmem:[#allocation2 + $0x30] sm:$0xff] (!%p105_p3), %vm144_vm0, %v1561_v0  ;;  %152 = vst.msk [vmem:[#allocation2 + $0x38] sm:$0xff] (!%p105_p3), %vm144_vm0, %v1561_v0 }
   0xb   : > { %153 = vst.msk [vmem:[#allocation2 + $0x40] sm:$0xff] (!%p105_p3), %vm144_vm0, %v1561_v0  ;;  %154 = vst.msk [vmem:[#allocation2 + $0x48] sm:$0xff] (!%p105_p3), %vm144_vm0, %v1561_v0 }
   0xc   : > { %155 = vst.msk [vmem:[#allocation2 + $0x50] sm:$0xff] (!%p105_p3), %vm144_vm0, %v1561_v0  ;;  %156 = vst.msk [vmem:[#allocation2 + $0x58] sm:$0xff] (!%p105_p3), %vm144_vm0, %v1561_v0 }
   0xd   : > { %157 = vst.msk [vmem:[#allocation2 + $0x60] sm:$0xff] (!%p105_p3), %vm144_vm0, %v1561_v0  ;;  %158 = vst.msk [vmem:[#allocation2 + $0x68] sm:$0xff] (!%p105_p3), %vm144_vm0, %v1561_v0 }
   0xe   : > { %159 = vst.msk [vmem:[#allocation2 + $0x70] sm:$0xff] %vm144_vm0, %v1561_v0  ;;  %160 = vst.msk [vmem:[#allocation2 + $0x78] sm:$0xff] %vm144_vm0, %v1561_v0  ;;  %s2525_s6 = smov (!%p127_p4, %s1551_s6), 1  ;;  %v275_v7 = vld [vmem:[#allocation2 + $0x10] sm:$0xff]  ;;  %v273_v8 = vld [vmem:[#allocation2] sm:$0xff] }
   0xf   : > { %161 = vst.msk [vmem:[#allocation2 + $0x80] sm:$0xff] %vm144_vm0, %v1561_v0  ;;  %162 = vst.msk [vmem:[#allocation2 + $0x88] sm:$0xff] %vm144_vm0, %v1561_v0  ;;  %s1510_s10 = sshll.u32 %s2525_s6, 10  ;;  %v276_v9 = vld [vmem:[#allocation2 + $0x18] sm:$0xff]  ;;  %v274_v13 = vld [vmem:[#allocation2 + $0x8] sm:$0xff] }
  0x10   : > { %163 = vst.msk [vmem:[#allocation2 + $0x90] sm:$0xff] %vm144_vm0, %v1561_v0  ;;  %164 = vst.msk [vmem:[#allocation2 + $0x98] sm:$0xff] %vm144_vm0, %v1561_v0  ;;  %s1860_s13 = scalar_lea.vmem %s2518_s0, %s1510_s10  ;;  %v278_v14 = vld [vmem:[#allocation2 + $0x28] sm:$0xff]  ;;  %v277_v15 = vld [vmem:[#allocation2 + $0x20] sm:$0xff]  ;;  %s2195_s16 = scalar_lea.vmem %s2519_s1, %s1510_s10 }
  0x11   : > { %165 = vst.msk [vmem:[#allocation2 + $0xa0] sm:$0xff] %vm144_vm0, %v1561_v0  ;;  %166 = vst.msk [vmem:[#allocation2 + $0xa8] sm:$0xff] %vm144_vm0, %v1561_v0  ;;  %v403_v1 = vld [vmem:[%s1860_s13 + $0x10] sm:$0xff]  ;;  %v401_v2 = vld [vmem:[%s1860_s13] sm:$0xff] }
  0x12   : > { %167 = vst.msk [vmem:[#allocation2 + $0xb0] sm:$0xff] %vm144_vm0, %v1561_v0  ;;  %168 = vst.msk [vmem:[#allocation2 + $0xb8] sm:$0xff] %vm144_vm0, %v1561_v0  ;;  %v404_v3 = vld [vmem:[%s1860_s13 + $0x18] sm:$0xff]  ;;  %v402_v4 = vld [vmem:[%s1860_s13 + $0x8] sm:$0xff]  ;;  %v531_v10 = vmax.f32 %v275_v7, %v403_v1  ;;  %v529_v11 = vmax.f32 %v273_v8, %v401_v2 }
  0x13   : > { %169 = vst.msk [vmem:[#allocation2 + $0xc0] sm:$0xff] %vm144_vm0, %v1561_v0  ;;  %170 = vst.msk [vmem:[#allocation2 + $0xc8] sm:$0xff] %vm144_vm0, %v1561_v0  ;;  %v406_v5 = vld [vmem:[%s1860_s13 + $0x28] sm:$0xff]  ;;  %v405_v6 = vld [vmem:[%s1860_s13 + $0x20] sm:$0xff]  ;;  %v532_v12 = vmax.f32 %v276_v9, %v404_v3  ;;  %v530_v16 = vmax.f32 %v274_v13, %v402_v4 }
  0x14   : > { %171 = vst.msk [vmem:[#allocation2 + $0xd0] sm:$0xff] %vm144_vm0, %v1561_v0  ;;  %172 = vst.msk [vmem:[#allocation2 + $0xd8] sm:$0xff] %vm144_vm0, %v1561_v0  ;;  %v534_v17 = vmax.f32 %v278_v14, %v406_v5  ;;  %v533_v18 = vmax.f32 %v277_v15, %v405_v6  ;;  %v280_v19 = vld [vmem:[#allocation2 + $0x38] sm:$0xff]  ;;  %v279_v21 = vld [vmem:[#allocation2 + $0x30] sm:$0xff] }
  0x15   : > { %173 = vst.msk [vmem:[#allocation2 + $0xe0] sm:$0xff] %vm144_vm0, %v1561_v0  ;;  %174 = vst.msk [vmem:[#allocation2 + $0xe8] sm:$0xff] %vm144_vm0, %v1561_v0  ;;  %v408_v20 = vld [vmem:[%s1860_s13 + $0x38] sm:$0xff]  ;;  %v407_v23 = vld [vmem:[%s1860_s13 + $0x30] sm:$0xff] }
  0x16   : > { %175 = vst.msk [vmem:[#allocation2 + $0xf0] sm:$0xff] %vm144_vm0, %v1561_v0  ;;  %176 = vst.msk [vmem:[#allocation2 + $0xf8] sm:$0xff] %vm144_vm0, %v1561_v0  ;;  %v536_v22 = vmax.f32 %v280_v19, %v408_v20  ;;  %v282_v24 = vld [vmem:[#allocation2 + $0x48] sm:$0xff]  ;;  %v535_v26 = vmax.f32 %v279_v21, %v407_v23  ;;  %v281_v28 = vld [vmem:[#allocation2 + $0x40] sm:$0xff] }
  0x17   : > { %177 = vst.msk [vmem:[#allocation2 + $0x100] sm:$0xff] %vm144_vm0, %v1561_v0  ;;  %178 = vst.msk [vmem:[#allocation2 + $0x108] sm:$0xff] %vm144_vm0, %v1561_v0  ;;  %v410_v25 = vld [vmem:[%s1860_s13 + $0x48] sm:$0xff]  ;;  %v409_v29 = vld [vmem:[%s1860_s13 + $0x40] sm:$0xff] }
  0x18   : > { %179 = vst.msk [vmem:[#allocation2 + $0x110] sm:$0xff] %vm144_vm0, %v1561_v0  ;;  %180 = vst.msk [vmem:[#allocation2 + $0x118] sm:$0xff] %vm144_vm0, %v1561_v0  ;;  %v538_v27 = vmax.f32 %v282_v24, %v410_v25  ;;  %v284_v30 = vld [vmem:[#allocation2 + $0x58] sm:$0xff]  ;;  %v537_v31 = vmax.f32 %v281_v28, %v409_v29  ;;  %v283_v33 = vld [vmem:[#allocation2 + $0x50] sm:$0xff] }
  0x19   : > { %181 = vst.msk [vmem:[#allocation2 + $0x120] sm:$0xff] %vm144_vm0, %v1561_v0  ;;  %182 = vst.msk [vmem:[#allocation2 + $0x128] sm:$0xff] %vm144_vm0, %v1561_v0  ;;  %v412_v32 = vld [vmem:[%s1860_s13 + $0x58] sm:$0xff]  ;;  %v411_v34 = vld [vmem:[%s1860_s13 + $0x50] sm:$0xff] }
  0x1a   : > { %183 = vst.msk [vmem:[#allocation2 + $0x130] sm:$0xff] %vm144_vm0, %v1561_v0  ;;  %184 = vst.msk [vmem:[#allocation2 + $0x138] sm:$0xff] %vm144_vm0, %v1561_v0  ;;  %v540_v35 = vmax.f32 %v284_v30, %v412_v32  ;;  %v539_v36 = vmax.f32 %v283_v33, %v411_v34  ;;  %v286_v37 = vld [vmem:[#allocation2 + $0x68] sm:$0xff]  ;;  %v285_v39 = vld [vmem:[#allocation2 + $0x60] sm:$0xff] }
  0x1b   : > { %185 = vst.msk [vmem:[#allocation2 + $0x140] sm:$0xff] %vm144_vm0, %v1561_v0  ;;  %186 = vst.msk [vmem:[#allocation2 + $0x148] sm:$0xff] %vm144_vm0, %v1561_v0  ;;  %v414_v38 = vld [vmem:[%s1860_s13 + $0x68] sm:$0xff]  ;;  %v413_v41 = vld [vmem:[%s1860_s13 + $0x60] sm:$0xff] }
  0x1c   : > { %187 = vst.msk [vmem:[#allocation2 + $0x150] sm:$0xff] %vm144_vm0, %v1561_v0  ;;  %188 = vst.msk [vmem:[#allocation2 + $0x158] sm:$0xff] %vm144_vm0, %v1561_v0  ;;  %v542_v40 = vmax.f32 %v286_v37, %v414_v38  ;;  %v288_v42 = vld [vmem:[#allocation2 + $0x78] sm:$0xff]  ;;  %v541_v44 = vmax.f32 %v285_v39, %v413_v41  ;;  %v287_v46 = vld [vmem:[#allocation2 + $0x70] sm:$0xff] }
  0x1d   : > { %189 = vst.msk [vmem:[#allocation2 + $0x160] sm:$0xff] %vm144_vm0, %v1561_v0  ;;  %190 = vst.msk [vmem:[#allocation2 + $0x168] sm:$0xff] %vm144_vm0, %v1561_v0  ;;  %v416_v43 = vld [vmem:[%s1860_s13 + $0x78] sm:$0xff]  ;;  %v415_v47 = vld [vmem:[%s1860_s13 + $0x70] sm:$0xff] }
  0x1e   : > { %191 = vst.msk [vmem:[#allocation2 + $0x170] sm:$0xff] %vm144_vm0, %v1561_v0  ;;  %192 = vst.msk [vmem:[#allocation2 + $0x178] sm:$0xff] %vm144_vm0, %v1561_v0  ;;  %v544_v45 = vmax.f32 %v288_v42, %v416_v43  ;;  %v290_v48 = vld [vmem:[#allocation2 + $0x88] sm:$0xff]  ;;  %v543_v49 = vmax.f32 %v287_v46, %v415_v47  ;;  %v289_v51 = vld [vmem:[#allocation2 + $0x80] sm:$0xff] }
  0x1f   : > { %193 = vst.msk [vmem:[#allocation2 + $0x180] sm:$0xff] %vm144_vm0, %v1561_v0  ;;  %194 = vst.msk [vmem:[#allocation2 + $0x188] sm:$0xff] %vm144_vm0, %v1561_v0  ;;  %v418_v50 = vld [vmem:[%s1860_s13 + $0x88] sm:$0xff]  ;;  %v417_v52 = vld [vmem:[%s1860_s13 + $0x80] sm:$0xff] }
  0x20   : > { %195 = vst.msk [vmem:[#allocation2 + $0x190] sm:$0xff] %vm144_vm0, %v1561_v0  ;;  %196 = vst.msk [vmem:[#allocation2 + $0x198] sm:$0xff] %vm144_vm0, %v1561_v0  ;;  %v546_v56 = vmax.f32 %v290_v48, %v418_v50  ;;  %v545_v57 = vmax.f32 %v289_v51, %v417_v52  ;;  %v292_v61 = vld [vmem:[#allocation2 + $0x98] sm:$0xff]  ;;  %v291_v3 = vld [vmem:[#allocation2 + $0x90] sm:$0xff] }
  0x21   : > { %197 = vst.msk [vmem:[#allocation2 + $0x1a0] sm:$0xff] %vm144_vm0, %v1561_v0  ;;  %198 = vst.msk [vmem:[#allocation2 + $0x1a8] sm:$0xff] %vm144_vm0, %v1561_v0  ;;  %v420_v62 = vld [vmem:[%s1860_s13 + $0x98] sm:$0xff]  ;;  %v419_v5 = vld [vmem:[%s1860_s13 + $0x90] sm:$0xff] }
  0x22   : > { %199 = vst.msk [vmem:[#allocation2 + $0x1b0] sm:$0xff] %vm144_vm0, %v1561_v0  ;;  %200 = vst.msk [vmem:[#allocation2 + $0x1b8] sm:$0xff] %vm144_vm0, %v1561_v0  ;;  %v548_v2 = vmax.f32 %v292_v61, %v420_v62  ;;  %v294_v6 = vld [vmem:[#allocation2 + $0xa8] sm:$0xff]  ;;  %v547_v7 = vmax.f32 %v291_v3, %v419_v5  ;;  %v295_v19 = vld [vmem:[#allocation2 + $0xb0] sm:$0xff] }
  0x23   : > { %201 = vst.msk [vmem:[#allocation2 + $0x1c0] sm:$0xff] %vm144_vm0, %v1561_v0  ;;  %202 = vst.msk [vmem:[#allocation2 + $0x1c8] sm:$0xff] %vm144_vm0, %v1561_v0  ;;  %v422_v8 = vld [vmem:[%s1860_s13 + $0xa8] sm:$0xff]  ;;  %v423_v21 = vld [vmem:[%s1860_s13 + $0xb0] sm:$0xff] }
  0x24   : > { %203 = vst.msk [vmem:[#allocation2 + $0x1d0] sm:$0xff] %vm144_vm0, %v1561_v0  ;;  %204 = vst.msk [vmem:[#allocation2 + $0x1d8] sm:$0xff] %vm144_vm0, %v1561_v0  ;;  %v550_v9 = vmax.f32 %v294_v6, %v422_v8  ;;  %v551_v23 = vmax.f32 %v295_v19, %v423_v21  ;;  %v298_v24 = vld [vmem:[#allocation2 + $0xc8] sm:$0xff]  ;;  %v425_v30 = vld [vmem:[%s1860_s13 + $0xc0] sm:$0xff] }
  0x25   : > { %205 = vst.msk [vmem:[#allocation2 + $0x1e0] sm:$0xff] %vm144_vm0, %v1561_v0  ;;  %206 = vst.msk [vmem:[#allocation2 + $0x1e8] sm:$0xff] %vm144_vm0, %v1561_v0  ;;  %v426_v25 = vld [vmem:[%s1860_s13 + $0xc8] sm:$0xff]  ;;  %v428_v32 = vld [vmem:[%s1860_s13 + $0xd8] sm:$0xff] }
  0x26   : > { %207 = vst.msk [vmem:[#allocation2 + $0x1f0] sm:$0xff] %vm144_vm0, %v1561_v0  ;;  %208 = vst.msk [vmem:[#allocation2 + $0x1f8] sm:$0xff] %vm144_vm0, %v1561_v0  ;;  %v554_v29 = vmax.f32 %v298_v24, %v426_v25  ;;  %v427_v37 = vld [vmem:[%s1860_s13 + $0xd0] sm:$0xff]  ;;  %v302_v39 = vld [vmem:[#allocation2 + $0xe8] sm:$0xff] }
  0x27   : > { %209 = vst.msk [vmem:[#allocation2 + $0x200] sm:$0xff] %vm144_vm0, %v1561_v0  ;;  %210 = vst.msk [vmem:[#allocation2 + $0x208] sm:$0xff] %vm144_vm0, %v1561_v0  ;;  %v301_v41 = vld [vmem:[#allocation2 + $0xe0] sm:$0xff]  ;;  %v303_v50 = vld [vmem:[#allocation2 + $0xf0] sm:$0xff] }
  0x28   : > { %211 = vst.msk [vmem:[#allocation2 + $0x210] sm:$0xff] %vm144_vm0, %v1561_v0  ;;  %212 = vst.msk [vmem:[#allocation2 + $0x218] sm:$0xff] %vm144_vm0, %v1561_v0  ;;  %v429_v43 = vld [vmem:[%s1860_s13 + $0xe0] sm:$0xff]  ;;  %v308_v61 = vld [vmem:[#allocation2 + $0x118] sm:$0xff] }
  0x29   : > { %213 = vst.msk [vmem:[#allocation2 + $0x220] sm:$0xff] %vm144_vm0, %v1561_v0  ;;  %214 = vst.msk [vmem:[#allocation2 + $0x228] sm:$0xff] %vm144_vm0, %v1561_v0  ;;  %v557_v48 = vmax.f32 %v301_v41, %v429_v43  ;;  %v436_v62 = vld [vmem:[%s1860_s13 + $0x118] sm:$0xff]  ;;  %v307_v3 = vld [vmem:[#allocation2 + $0x110] sm:$0xff] }
  0x2a   : > { %215 = vst.msk [vmem:[#allocation2 + $0x230] sm:$0xff] %vm144_vm0, %v1561_v0  ;;  %216 = vst.msk [vmem:[#allocation2 + $0x238] sm:$0xff] %vm144_vm0, %v1561_v0  ;;  %v438_v8 = vld [vmem:[%s1860_s13 + $0x128] sm:$0xff]  ;;  %v439_v21 = vld [vmem:[%s1860_s13 + $0x130] sm:$0xff] }
  0x2b   : > { %217 = vst.msk [vmem:[#allocation2 + $0x240] sm:$0xff] %vm144_vm0, %v1561_v0  ;;  %218 = vst.msk [vmem:[#allocation2 + $0x248] sm:$0xff] %vm144_vm0, %v1561_v0  ;;  %v442_v24 = vld [vmem:[%s1860_s13 + $0x148] sm:$0xff]  ;;  %v313_v25 = vld [vmem:[#allocation2 + $0x140] sm:$0xff] }
  0x2c   : > { %219 = vst.msk [vmem:[#allocation2 + $0x250] sm:$0xff] %vm144_vm0, %v1561_v0  ;;  %220 = vst.msk [vmem:[#allocation2 + $0x258] sm:$0xff] %vm144_vm0, %v1561_v0  ;;  %v317_v43 = vld [vmem:[#allocation2 + $0x160] sm:$0xff] }
  0x2d   : > { %221 = vst.msk [vmem:[#allocation2 + $0x260] sm:$0xff] %vm144_vm0, %v1561_v0  ;;  %222 = vst.msk [vmem:[#allocation2 + $0x268] sm:$0xff] %vm144_vm0, %v1561_v0 }
  0x2e   : > { %223 = vst.msk [vmem:[#allocation2 + $0x270] sm:$0xff] %vm144_vm0, %v1561_v0  ;;  %224 = vst.msk [vmem:[#allocation2 + $0x278] sm:$0xff] %vm144_vm0, %v1561_v0 }
  0x2f   : > { %225 = vst.msk [vmem:[#allocation2 + $0x280] sm:$0xff] %vm144_vm0, %v1561_v0  ;;  %226 = vst.msk [vmem:[#allocation2 + $0x288] sm:$0xff] %vm144_vm0, %v1561_v0 }
  0x30   : > { %227 = vst.msk [vmem:[#allocation2 + $0x290] sm:$0xff] %vm144_vm0, %v1561_v0  ;;  %228 = vst.msk [vmem:[#allocation2 + $0x298] sm:$0xff] %vm144_vm0, %v1561_v0 }
  0x31   : > { %229 = vst.msk [vmem:[#allocation2 + $0x2a0] sm:$0xff] %vm144_vm0, %v1561_v0  ;;  %230 = vst.msk [vmem:[#allocation2 + $0x2a8] sm:$0xff] %vm144_vm0, %v1561_v0 }
  0x32   : > { %231 = vst.msk [vmem:[#allocation2 + $0x2b0] sm:$0xff] %vm144_vm0, %v1561_v0  ;;  %232 = vst.msk [vmem:[#allocation2 + $0x2b8] sm:$0xff] %vm144_vm0, %v1561_v0 }
  0x33   : > { %233 = vst.msk [vmem:[#allocation2 + $0x2c0] sm:$0xff] %vm144_vm0, %v1561_v0  ;;  %234 = vst.msk [vmem:[#allocation2 + $0x2c8] sm:$0xff] %vm144_vm0, %v1561_v0 }
  0x34   : > { %235 = vst.msk [vmem:[#allocation2 + $0x2d0] sm:$0xff] %vm144_vm0, %v1561_v0  ;;  %236 = vst.msk [vmem:[#allocation2 + $0x2d8] sm:$0xff] %vm144_vm0, %v1561_v0 }
  0x35   : > { %237 = vst.msk [vmem:[#allocation2 + $0x2e0] sm:$0xff] %vm144_vm0, %v1561_v0  ;;  %238 = vst.msk [vmem:[#allocation2 + $0x2e8] sm:$0xff] %vm144_vm0, %v1561_v0 }
  0x36   : > { %239 = vst.msk [vmem:[#allocation2 + $0x2f0] sm:$0xff] %vm144_vm0, %v1561_v0  ;;  %240 = vst.msk [vmem:[#allocation2 + $0x2f8] sm:$0xff] %vm144_vm0, %v1561_v0 }
  0x37   : > { %241 = vst.msk [vmem:[#allocation2 + $0x300] sm:$0xff] %vm144_vm0, %v1561_v0  ;;  %242 = vst.msk [vmem:[#allocation2 + $0x308] sm:$0xff] %vm144_vm0, %v1561_v0 }
  0x38   : > { %243 = vst.msk [vmem:[#allocation2 + $0x310] sm:$0xff] %vm144_vm0, %v1561_v0  ;;  %244 = vst.msk [vmem:[#allocation2 + $0x318] sm:$0xff] %vm144_vm0, %v1561_v0 }
  0x39   : > { %245 = vst.msk [vmem:[#allocation2 + $0x320] sm:$0xff] %vm144_vm0, %v1561_v0  ;;  %246 = vst.msk [vmem:[#allocation2 + $0x328] sm:$0xff] %vm144_vm0, %v1561_v0 }
  0x3a   : > { %247 = vst.msk [vmem:[#allocation2 + $0x330] sm:$0xff] %vm144_vm0, %v1561_v0  ;;  %248 = vst.msk [vmem:[#allocation2 + $0x338] sm:$0xff] %vm144_vm0, %v1561_v0 }
  0x3b   : > { %249 = vst.msk [vmem:[#allocation2 + $0x340] sm:$0xff] %vm144_vm0, %v1561_v0  ;;  %250 = vst.msk [vmem:[#allocation2 + $0x348] sm:$0xff] %vm144_vm0, %v1561_v0 }
  0x3c   : > { %251 = vst.msk [vmem:[#allocation2 + $0x350] sm:$0xff] %vm144_vm0, %v1561_v0  ;;  %252 = vst.msk [vmem:[#allocation2 + $0x358] sm:$0xff] %vm144_vm0, %v1561_v0 }
  0x3d   : > { %253 = vst.msk [vmem:[#allocation2 + $0x360] sm:$0xff] %vm144_vm0, %v1561_v0  ;;  %254 = vst.msk [vmem:[#allocation2 + $0x368] sm:$0xff] %vm144_vm0, %v1561_v0 }
  0x3e   : > { %255 = vst.msk [vmem:[#allocation2 + $0x370] sm:$0xff] %vm144_vm0, %v1561_v0  ;;  %256 = vst.msk [vmem:[#allocation2 + $0x378] sm:$0xff] %vm144_vm0, %v1561_v0 }
  0x3f   : > { %257 = vst.msk [vmem:[#allocation2 + $0x380] sm:$0xff] %vm144_vm0, %v1561_v0  ;;  %258 = vst.msk [vmem:[#allocation2 + $0x388] sm:$0xff] %vm144_vm0, %v1561_v0 }
  0x40   : > { %259 = vst.msk [vmem:[#allocation2 + $0x390] sm:$0xff] %vm144_vm0, %v1561_v0  ;;  %260 = vst.msk [vmem:[#allocation2 + $0x398] sm:$0xff] %vm144_vm0, %v1561_v0 }
  0x41   : > { %261 = vst.msk [vmem:[#allocation2 + $0x3a0] sm:$0xff] %vm144_vm0, %v1561_v0  ;;  %262 = vst.msk [vmem:[#allocation2 + $0x3a8] sm:$0xff] %vm144_vm0, %v1561_v0 }
  0x42   : > { %263 = vst.msk [vmem:[#allocation2 + $0x3b0] sm:$0xff] %vm144_vm0, %v1561_v0  ;;  %264 = vst.msk [vmem:[#allocation2 + $0x3b8] sm:$0xff] %vm144_vm0, %v1561_v0 }
  0x43   : > { %265 = vst.msk [vmem:[#allocation2 + $0x3c0] sm:$0xff] %vm144_vm0, %v1561_v0  ;;  %266 = vst.msk [vmem:[#allocation2 + $0x3c8] sm:$0xff] %vm144_vm0, %v1561_v0 }
  0x44   : > { %267 = vst.msk [vmem:[#allocation2 + $0x3d0] sm:$0xff] %vm144_vm0, %v1561_v0  ;;  %268 = vst.msk [vmem:[#allocation2 + $0x3d8] sm:$0xff] %vm144_vm0, %v1561_v0 }
  0x45   : > { %269 = vst.msk [vmem:[#allocation2 + $0x3e0] sm:$0xff] %vm144_vm0, %v1561_v0  ;;  %270 = vst.msk [vmem:[#allocation2 + $0x3e8] sm:$0xff] %vm144_vm0, %v1561_v0 }
  0x46   : > { %271 = vst.msk [vmem:[#allocation2 + $0x3f0] sm:$0xff] %vm144_vm0, %v1561_v0  ;;  %272 = vst.msk [vmem:[#allocation2 + $0x3f8] sm:$0xff] %vm144_vm0, %v1561_v0 }
  0x47   : > { %660 = vst.msk [vmem:[#allocation2 + $0x10] sm:$0xff] %vm144_vm0, %v531_v10  ;;  %658 = vst.msk [vmem:[#allocation2] sm:$0xff] %vm144_vm0, %v529_v11  ;;  %v293_v10 = vld [vmem:[#allocation2 + $0xa0] sm:$0xff] }
  0x48   : > { %661 = vst.msk [vmem:[#allocation2 + $0x18] sm:$0xff] %vm144_vm0, %v532_v12  ;;  %659 = vst.msk [vmem:[#allocation2 + $0x8] sm:$0xff] %vm144_vm0, %v530_v16  ;;  %v421_v11 = vld [vmem:[%s1860_s13 + $0xa0] sm:$0xff]  ;;  %v296_v16 = vld [vmem:[#allocation2 + $0xb8] sm:$0xff] }
  0x49   : > { %663 = vst.msk [vmem:[#allocation2 + $0x28] sm:$0xff] %vm144_vm0, %v534_v17  ;;  %662 = vst.msk [vmem:[#allocation2 + $0x20] sm:$0xff] %vm144_vm0, %v533_v18  ;;  %v549_v15 = vmax.f32 %v293_v10, %v421_v11  ;;  %v424_v18 = vld [vmem:[%s1860_s13 + $0xb8] sm:$0xff]  ;;  %v309_v10 = vld [vmem:[#allocation2 + $0x120] sm:$0xff] }
  0x4a   : > { %665 = vst.msk [vmem:[#allocation2 + $0x38] sm:$0xff] %vm144_vm0, %v536_v22  ;;  %664 = vst.msk [vmem:[#allocation2 + $0x30] sm:$0xff] %vm144_vm0, %v535_v26  ;;  %v552_v20 = vmax.f32 %v296_v16, %v424_v18  ;;  %v297_v26 = vld [vmem:[#allocation2 + $0xc0] sm:$0xff]  ;;  %v311_v18 = vld [vmem:[#allocation2 + $0x130] sm:$0xff] }
  0x4b   : > { %667 = vst.msk [vmem:[#allocation2 + $0x48] sm:$0xff] %vm144_vm0, %v538_v27  ;;  %666 = vst.msk [vmem:[#allocation2 + $0x40] sm:$0xff] %vm144_vm0, %v537_v31  ;;  %v300_v31 = vld [vmem:[#allocation2 + $0xd8] sm:$0xff]  ;;  %v553_v34 = vmax.f32 %v297_v26, %v425_v30  ;;  %v437_v11 = vld [vmem:[%s1860_s13 + $0x120] sm:$0xff] }
  0x4c   : > { %669 = vst.msk [vmem:[#allocation2 + $0x58] sm:$0xff] %vm144_vm0, %v540_v35  ;;  %668 = vst.msk [vmem:[#allocation2 + $0x50] sm:$0xff] %vm144_vm0, %v539_v36  ;;  %v556_v35 = vmax.f32 %v300_v31, %v428_v32  ;;  %v299_v36 = vld [vmem:[#allocation2 + $0xd0] sm:$0xff]  ;;  %v565_v16 = vmax.f32 %v309_v10, %v437_v11  ;;  %v453_v11 = vld [vmem:[%s1860_s13 + $0x1a0] sm:$0xff] }
  0x4d   : > { %671 = vst.msk [vmem:[#allocation2 + $0x68] sm:$0xff] %vm144_vm0, %v542_v40  ;;  %670 = vst.msk [vmem:[#allocation2 + $0x60] sm:$0xff] %vm144_vm0, %v541_v44  ;;  %v555_v38 = vmax.f32 %v299_v36, %v427_v37  ;;  %v430_v40 = vld [vmem:[%s1860_s13 + $0xe8] sm:$0xff]  ;;  %v304_v44 = vld [vmem:[#allocation2 + $0xf8] sm:$0xff] }
  0x4e   : > { %v791_v53 = vld [vmem:[#allocation2 + $0x10] sm:$0xff]  ;;  %v789_v54 = vld [vmem:[#allocation2] sm:$0xff]  ;;  %673 = vst.msk [vmem:[#allocation2 + $0x78] sm:$0xff] %vm144_vm0, %v544_v45  ;;  %672 = vst.msk [vmem:[#allocation2 + $0x70] sm:$0xff] %vm144_vm0, %v543_v49  ;;  %v558_v42 = vmax.f32 %v302_v39, %v430_v40 }
  0x4f   : > { %v792_v55 = vld [vmem:[#allocation2 + $0x18] sm:$0xff]  ;;  %v923_v58 = vsel %vm144_vm0, %v791_v53, -inf  ;;  %v917_v59 = vsel %vm144_vm0, %v789_v54, -inf  ;;  %v790_v60 = vld [vmem:[#allocation2 + $0x8] sm:$0xff]  ;;  %675 = vst.msk [vmem:[#allocation2 + $0x88] sm:$0xff] %vm144_vm0, %v546_v56  ;;  %674 = vst.msk [vmem:[#allocation2 + $0x80] sm:$0xff] %vm144_vm0, %v545_v57 }
  0x50   : > { %924 = vmax.xlane.f32.xlu1 %v923_v58  ;;  %918 = vmax.xlane.f32.xlu0 %v917_v59  ;;  %v926_v63 = vsel %vm144_vm0, %v792_v55, -inf  ;;  %v920_v0 = vsel %vm144_vm0, %v790_v60, -inf  ;;  %v794_v1 = vld [vmem:[#allocation2 + $0x28] sm:$0xff]  ;;  %v793_v4 = vld [vmem:[#allocation2 + $0x20] sm:$0xff]  ;;  %677 = vst.msk [vmem:[#allocation2 + $0x98] sm:$0xff] %vm144_vm0, %v548_v2  ;;  %676 = vst.msk [vmem:[#allocation2 + $0x90] sm:$0xff] %vm144_vm0, %v547_v7  ;;  %v564_v2 = vmax.f32 %v308_v61, %v436_v62 }
  0x51   : > { %v932_v12 = vsel %vm144_vm0, %v794_v1, -inf  ;;  %v929_v13 = vsel %vm144_vm0, %v793_v4, -inf  ;;  %v796_v14 = vld [vmem:[#allocation2 + $0x38] sm:$0xff]  ;;  %v795_v17 = vld [vmem:[#allocation2 + $0x30] sm:$0xff]  ;;  %679 = vst.msk [vmem:[#allocation2 + $0xa8] sm:$0xff] %vm144_vm0, %v550_v9  ;;  %678 = vst.msk [vmem:[#allocation2 + $0xa0] sm:$0xff] %vm144_vm0, %v549_v15 }
  0x52   : > { %v798_v22 = vld [vmem:[#allocation2 + $0x48] sm:$0xff]  ;;  %v938_v27 = vsel %vm144_vm0, %v796_v14, -inf  ;;  %v935_v28 = vsel %vm144_vm0, %v795_v17, -inf  ;;  %681 = vst.msk [vmem:[#allocation2 + $0xb8] sm:$0xff] %vm144_vm0, %v552_v20  ;;  %v797_v33 = vld [vmem:[#allocation2 + $0x40] sm:$0xff]  ;;  %680 = vst.msk [vmem:[#allocation2 + $0xb0] sm:$0xff] %vm144_vm0, %v551_v23  ;;  %v567_v23 = vmax.f32 %v311_v18, %v439_v21 }
  0x53   : > { %683 = vst.msk [vmem:[#allocation2 + $0xc8] sm:$0xff] %vm144_vm0, %v554_v29  ;;  %682 = vst.msk [vmem:[#allocation2 + $0xc0] sm:$0xff] %vm144_vm0, %v553_v34  ;;  %v944_v45 = vsel %vm144_vm0, %v798_v22, -inf  ;;  %v941_v46 = vsel %vm144_vm0, %v797_v33, -inf  ;;  %v800_v47 = vld [vmem:[#allocation2 + $0x58] sm:$0xff]  ;;  %v799_v51 = vld [vmem:[#allocation2 + $0x50] sm:$0xff] }
  0x54   : > { %927 = vmax.xlane.f32.xlu1 %v926_v63  ;;  %921 = vmax.xlane.f32.xlu0 %v920_v0  ;;  %685 = vst.msk [vmem:[#allocation2 + $0xd8] sm:$0xff] %vm144_vm0, %v556_v35  ;;  %684 = vst.msk [vmem:[#allocation2 + $0xd0] sm:$0xff] %vm144_vm0, %v555_v38  ;;  %v432_v49 = vld [vmem:[%s1860_s13 + $0xf8] sm:$0xff]  ;;  %v431_v53 = vld [vmem:[%s1860_s13 + $0xf0] sm:$0xff]  ;;  %v950_v63 = vsel %vm144_vm0, %v800_v47, -inf  ;;  %v947_v0 = vsel %vm144_vm0, %v799_v51, -inf }
  0x55   : > { %687 = vst.msk [vmem:[#allocation2 + $0xe8] sm:$0xff] %vm144_vm0, %v558_v42  ;;  %v560_v52 = vmax.f32 %v304_v44, %v432_v49  ;;  %v306_v54 = vld [vmem:[#allocation2 + $0x108] sm:$0xff]  ;;  %686 = vst.msk [vmem:[#allocation2 + $0xe0] sm:$0xff] %vm144_vm0, %v557_v48  ;;  %v559_v55 = vmax.f32 %v303_v50, %v431_v53  ;;  %v305_v57 = vld [vmem:[#allocation2 + $0x100] sm:$0xff] }
  0x56   : > { %v434_v56 = vld [vmem:[%s1860_s13 + $0x108] sm:$0xff]  ;;  %v433_v58 = vld [vmem:[%s1860_s13 + $0x100] sm:$0xff]  ;;  %v435_v4 = vld [vmem:[%s1860_s13 + $0x110] sm:$0xff]  ;;  %693 = vst.msk [vmem:[#allocation2 + $0x118] sm:$0xff] %vm144_vm0, %v564_v2 }
  0x57   : > { %689 = vst.msk [vmem:[#allocation2 + $0xf8] sm:$0xff] %vm144_vm0, %v560_v52  ;;  %v562_v59 = vmax.f32 %v306_v54, %v434_v56  ;;  %v561_v60 = vmax.f32 %v305_v57, %v433_v58  ;;  %v802_v1 = vld [vmem:[#allocation2 + $0x68] sm:$0xff]  ;;  %688 = vst.msk [vmem:[#allocation2 + $0xf0] sm:$0xff] %vm144_vm0, %v559_v55  ;;  %v801_v5 = vld [vmem:[#allocation2 + $0x60] sm:$0xff]  ;;  %v563_v6 = vmax.f32 %v307_v3, %v435_v4 }
  0x58   : > { %933 = vmax.xlane.f32.xlu1 %v932_v12  ;;  %930 = vmax.xlane.f32.xlu0 %v929_v13  ;;  %v310_v7 = vld [vmem:[#allocation2 + $0x128] sm:$0xff]  ;;  %v312_v12 = vld [vmem:[#allocation2 + $0x138] sm:$0xff]  ;;  %v956_v13 = vsel %vm144_vm0, %v802_v1, -inf  ;;  %v953_v14 = vsel %vm144_vm0, %v801_v5, -inf  ;;  %v803_v19 = vld [vmem:[#allocation2 + $0x70] sm:$0xff]  ;;  %694 = vst.msk [vmem:[#allocation2 + $0x120] sm:$0xff] %vm144_vm0, %v565_v16 }
  0x59   : > { %691 = vst.msk [vmem:[#allocation2 + $0x108] sm:$0xff] %vm144_vm0, %v562_v59  ;;  %690 = vst.msk [vmem:[#allocation2 + $0x100] sm:$0xff] %vm144_vm0, %v561_v60  ;;  %v566_v9 = vmax.f32 %v310_v7, %v438_v8  ;;  %v804_v15 = vld [vmem:[#allocation2 + $0x78] sm:$0xff]  ;;  %v314_v22 = vld [vmem:[#allocation2 + $0x148] sm:$0xff]  ;;  %v959_v30 = vsel %vm144_vm0, %v803_v19, -inf }
  0x5a   : > { %692 = vst.msk [vmem:[#allocation2 + $0x110] sm:$0xff] %vm144_vm0, %v563_v6  ;;  %v440_v17 = vld [vmem:[%s1860_s13 + $0x138] sm:$0xff]  ;;  %v570_v26 = vmax.f32 %v314_v22, %v442_v24  ;;  %v962_v29 = vsel %vm144_vm0, %v804_v15, -inf  ;;  %v806_v31 = vld [vmem:[#allocation2 + $0x88] sm:$0xff]  ;;  %696 = vst.msk [vmem:[#allocation2 + $0x130] sm:$0xff] %vm144_vm0, %v567_v23 }
  0x5b   : > { %695 = vst.msk [vmem:[#allocation2 + $0x128] sm:$0xff] %vm144_vm0, %v566_v9  ;;  %v568_v20 = vmax.f32 %v312_v12, %v440_v17  ;;  %v444_v33 = vld [vmem:[%s1860_s13 + $0x158] sm:$0xff]  ;;  %v805_v34 = vld [vmem:[#allocation2 + $0x80] sm:$0xff]  ;;  %v315_v36 = vld [vmem:[#allocation2 + $0x150] sm:$0xff] }
  0x5c   : > { %939 = vmax.xlane.f32.xlu1 %v938_v27  ;;  %936 = vmax.xlane.f32.xlu0 %v935_v28  ;;  %v441_v27 = vld [vmem:[%s1860_s13 + $0x140] sm:$0xff]  ;;  %v316_v28 = vld [vmem:[#allocation2 + $0x158] sm:$0xff]  ;;  %699 = vst.msk [vmem:[#allocation2 + $0x148] sm:$0xff] %vm144_vm0, %v570_v26  ;;  %v443_v37 = vld [vmem:[%s1860_s13 + $0x150] sm:$0xff] }
  0x5d   : > { %697 = vst.msk [vmem:[#allocation2 + $0x138] sm:$0xff] %vm144_vm0, %v568_v20  ;;  %v569_v32 = vmax.f32 %v313_v25, %v441_v27  ;;  %v572_v35 = vmax.f32 %v316_v28, %v444_v33  ;;  %v571_v38 = vmax.f32 %v315_v36, %v443_v37  ;;  %v318_v39 = vld [vmem:[#allocation2 + $0x168] sm:$0xff]  ;;  %v808_v41 = vld [vmem:[#allocation2 + $0x98] sm:$0xff]  ;;  %v445_v44 = vld [vmem:[%s1860_s13 + $0x160] sm:$0xff] }
  0x5e   : > { %v446_v40 = vld [vmem:[%s1860_s13 + $0x168] sm:$0xff]  ;;  %v573_v47 = vmax.f32 %v317_v43, %v445_v44  ;;  %v320_v48 = vld [vmem:[#allocation2 + $0x178] sm:$0xff]  ;;  %v319_v50 = vld [vmem:[#allocation2 + $0x170] sm:$0xff]  ;;  %v974_v61 = vsel %vm144_vm0, %v808_v41, -inf }
  0x5f   : > { %698 = vst.msk [vmem:[#allocation2 + $0x140] sm:$0xff] %vm144_vm0, %v569_v32  ;;  %701 = vst.msk [vmem:[#allocation2 + $0x158] sm:$0xff] %vm144_vm0, %v572_v35  ;;  %v574_v42 = vmax.f32 %v318_v39, %v446_v40  ;;  %v448_v49 = vld [vmem:[%s1860_s13 + $0x178] sm:$0xff]  ;;  %v807_v51 = vld [vmem:[#allocation2 + $0x90] sm:$0xff] }
  0x60   : > { %945 = vmax.xlane.f32.xlu1 %v944_v45  ;;  %942 = vmax.xlane.f32.xlu0 %v941_v46  ;;  %v968_v45 = vsel %vm144_vm0, %v806_v31, -inf  ;;  %v965_v46 = vsel %vm144_vm0, %v805_v34, -inf  ;;  %700 = vst.msk [vmem:[#allocation2 + $0x150] sm:$0xff] %vm144_vm0, %v571_v38  ;;  %v576_v52 = vmax.f32 %v320_v48, %v448_v49  ;;  %v447_v53 = vld [vmem:[%s1860_s13 + $0x170] sm:$0xff]  ;;  %v322_v54 = vld [vmem:[#allocation2 + $0x188] sm:$0xff]  ;;  %702 = vst.msk [vmem:[#allocation2 + $0x160] sm:$0xff] %vm144_vm0, %v573_v47 }
  0x61   : > { %703 = vst.msk [vmem:[#allocation2 + $0x168] sm:$0xff] %vm144_vm0, %v574_v42  ;;  %v575_v55 = vmax.f32 %v319_v50, %v447_v53  ;;  %v450_v56 = vld [vmem:[%s1860_s13 + $0x188] sm:$0xff]  ;;  %v321_v57 = vld [vmem:[#allocation2 + $0x180] sm:$0xff]  ;;  %v324_v60 = vld [vmem:[#allocation2 + $0x198] sm:$0xff]  ;;  %v971_v62 = vsel %vm144_vm0, %v807_v51, -inf }
  0x62   : > { %705 = vst.msk [vmem:[#allocation2 + $0x178] sm:$0xff] %vm144_vm0, %v576_v52  ;;  %v578_v58 = vmax.f32 %v322_v54, %v450_v56  ;;  %v449_v59 = vld [vmem:[%s1860_s13 + $0x180] sm:$0xff]  ;;  %v452_v1 = vld [vmem:[%s1860_s13 + $0x198] sm:$0xff]  ;;  %v323_v2 = vld [vmem:[#allocation2 + $0x190] sm:$0xff] }
  0x63   : > { %704 = vst.msk [vmem:[#allocation2 + $0x170] sm:$0xff] %vm144_vm0, %v575_v55  ;;  %v809_v3 = vld [vmem:[#allocation2 + $0xa0] sm:$0xff]  ;;  %v580_v4 = vmax.f32 %v324_v60, %v452_v1  ;;  %v451_v5 = vld [vmem:[%s1860_s13 + $0x190] sm:$0xff]  ;;  %v326_v6 = vld [vmem:[#allocation2 + $0x1a8] sm:$0xff] }
  0x64   : > { %951 = vmax.xlane.f32.xlu1 %v950_v63  ;;  %948 = vmax.xlane.f32.xlu0 %v947_v0  ;;  %v810_v63 = vld [vmem:[#allocation2 + $0xa8] sm:$0xff]  ;;  %v577_v0 = vmax.f32 %v321_v57, %v449_v59  ;;  %707 = vst.msk [vmem:[#allocation2 + $0x188] sm:$0xff] %vm144_vm0, %v578_v58  ;;  %v579_v7 = vmax.f32 %v323_v2, %v451_v5  ;;  %v325_v9 = vld [vmem:[#allocation2 + $0x1a0] sm:$0xff]  ;;  %v328_v12 = vld [vmem:[#allocation2 + $0x1b8] sm:$0xff] }
  0x65   : > { %v454_v8 = vld [vmem:[%s1860_s13 + $0x1a8] sm:$0xff]  ;;  %709 = vst.msk [vmem:[#allocation2 + $0x198] sm:$0xff] %vm144_vm0, %v580_v4  ;;  %v812_v15 = vld [vmem:[#allocation2 + $0xb8] sm:$0xff]  ;;  %v581_v16 = vmax.f32 %v325_v9, %v453_v11  ;;  %v327_v18 = vld [vmem:[#allocation2 + $0x1b0] sm:$0xff] }
  0x66   : > { %706 = vst.msk [vmem:[#allocation2 + $0x180] sm:$0xff] %vm144_vm0, %v577_v0  ;;  %v582_v10 = vmax.f32 %v326_v6, %v454_v8  ;;  %708 = vst.msk [vmem:[#allocation2 + $0x190] sm:$0xff] %vm144_vm0, %v579_v7  ;;  %v456_v17 = vld [vmem:[%s1860_s13 + $0x1b8] sm:$0xff]  ;;  %v811_v19 = vld [vmem:[#allocation2 + $0xb0] sm:$0xff] }
  0x67   : > { %v584_v20 = vmax.f32 %v328_v12, %v456_v17  ;;  %v455_v21 = vld [vmem:[%s1860_s13 + $0x1b0] sm:$0xff]  ;;  %v330_v22 = vld [vmem:[#allocation2 + $0x1c8] sm:$0xff]  ;;  %710 = vst.msk [vmem:[#allocation2 + $0x1a0] sm:$0xff] %vm144_vm0, %v581_v16  ;;  %v329_v25 = vld [vmem:[#allocation2 + $0x1c0] sm:$0xff] }
  0x68   : > { %957 = vmax.xlane.f32.xlu1 %v956_v13  ;;  %954 = vmax.xlane.f32.xlu0 %v953_v14  ;;  %v980_v13 = vsel %vm144_vm0, %v810_v63, -inf  ;;  %v977_v14 = vsel %vm144_vm0, %v809_v3, -inf  ;;  %711 = vst.msk [vmem:[#allocation2 + $0x1a8] sm:$0xff] %vm144_vm0, %v582_v10  ;;  %v583_v23 = vmax.f32 %v327_v18, %v455_v21  ;;  %v458_v24 = vld [vmem:[%s1860_s13 + $0x1c8] sm:$0xff]  ;;  %v457_v27 = vld [vmem:[%s1860_s13 + $0x1c0] sm:$0xff]  ;;  %v332_v28 = vld [vmem:[#allocation2 + $0x1d8] sm:$0xff] }
  0x69   : > { %713 = vst.msk [vmem:[#allocation2 + $0x1b8] sm:$0xff] %vm144_vm0, %v584_v20  ;;  %v586_v26 = vmax.f32 %v330_v22, %v458_v24  ;;  %v814_v31 = vld [vmem:[#allocation2 + $0xc8] sm:$0xff]  ;;  %v585_v32 = vmax.f32 %v329_v25, %v457_v27  ;;  %v460_v33 = vld [vmem:[%s1860_s13 + $0x1d8] sm:$0xff]  ;;  %v331_v34 = vld [vmem:[#allocation2 + $0x1d0] sm:$0xff] }
  0x6a   : > { %712 = vst.msk [vmem:[#allocation2 + $0x1b0] sm:$0xff] %vm144_vm0, %v583_v23  ;;  %v813_v35 = vld [vmem:[#allocation2 + $0xc0] sm:$0xff]  ;;  %v588_v36 = vmax.f32 %v332_v28, %v460_v33  ;;  %v459_v37 = vld [vmem:[%s1860_s13 + $0x1d0] sm:$0xff]  ;;  %v334_v38 = vld [vmem:[#allocation2 + $0x1e8] sm:$0xff] }
  0x6b   : > { %715 = vst.msk [vmem:[#allocation2 + $0x1c8] sm:$0xff] %vm144_vm0, %v586_v26  ;;  %714 = vst.msk [vmem:[#allocation2 + $0x1c0] sm:$0xff] %vm144_vm0, %v585_v32  ;;  %v587_v39 = vmax.f32 %v331_v34, %v459_v37  ;;  %v462_v40 = vld [vmem:[%s1860_s13 + $0x1e8] sm:$0xff]  ;;  %v333_v41 = vld [vmem:[#allocation2 + $0x1e0] sm:$0xff] }
  0x6c   : > { %963 = vmax.xlane.f32.xlu1 %v962_v29  ;;  %960 = vmax.xlane.f32.xlu0 %v959_v30  ;;  %v986_v29 = vsel %vm144_vm0, %v812_v15, -inf  ;;  %v983_v30 = vsel %vm144_vm0, %v811_v19, -inf  ;;  %717 = vst.msk [vmem:[#allocation2 + $0x1d8] sm:$0xff] %vm144_vm0, %v588_v36  ;;  %v590_v42 = vmax.f32 %v334_v38, %v462_v40  ;;  %v461_v43 = vld [vmem:[%s1860_s13 + $0x1e0] sm:$0xff]  ;;  %v336_v44 = vld [vmem:[#allocation2 + $0x1f8] sm:$0xff]  ;;  %v335_v50 = vld [vmem:[#allocation2 + $0x1f0] sm:$0xff] }
  0x6d   : > { %v816_v47 = vld [vmem:[#allocation2 + $0xd8] sm:$0xff]  ;;  %716 = vst.msk [vmem:[#allocation2 + $0x1d0] sm:$0xff] %vm144_vm0, %v587_v39  ;;  %v589_v48 = vmax.f32 %v333_v41, %v461_v43  ;;  %v815_v51 = vld [vmem:[#allocation2 + $0xd0] sm:$0xff]  ;;  %v338_v54 = vld [vmem:[#allocation2 + $0x208] sm:$0xff] }
  0x6e   : > { %v464_v49 = vld [vmem:[%s1860_s13 + $0x1f8] sm:$0xff]  ;;  %719 = vst.msk [vmem:[#allocation2 + $0x1e8] sm:$0xff] %vm144_vm0, %v590_v42  ;;  %v463_v53 = vld [vmem:[%s1860_s13 + $0x1f0] sm:$0xff]  ;;  %v466_v56 = vld [vmem:[%s1860_s13 + $0x208] sm:$0xff] }
  0x6f   : > { %v592_v52 = vmax.f32 %v336_v44, %v464_v49  ;;  %718 = vst.msk [vmem:[#allocation2 + $0x1e0] sm:$0xff] %vm144_vm0, %v589_v48  ;;  %v591_v55 = vmax.f32 %v335_v50, %v463_v53  ;;  %v337_v57 = vld [vmem:[#allocation2 + $0x200] sm:$0xff]  ;;  %v594_v58 = vmax.f32 %v338_v54, %v466_v56  ;;  %v340_v60 = vld [vmem:[#allocation2 + $0x218] sm:$0xff]  ;;  %v818_v63 = vld [vmem:[#allocation2 + $0xe8] sm:$0xff] }
  0x70   : > { %969 = vmax.xlane.f32.xlu1 %v968_v45  ;;  %966 = vmax.xlane.f32.xlu0 %v965_v46  ;;  %v992_v45 = vsel %vm144_vm0, %v814_v31, -inf  ;;  %v989_v46 = vsel %vm144_vm0, %v813_v35, -inf  ;;  %v465_v59 = vld [vmem:[%s1860_s13 + $0x200] sm:$0xff]  ;;  %v468_v1 = vld [vmem:[%s1860_s13 + $0x218] sm:$0xff]  ;;  %v339_v2 = vld [vmem:[#allocation2 + $0x210] sm:$0xff] }
  0x71   : > { %721 = vst.msk [vmem:[#allocation2 + $0x1f8] sm:$0xff] %vm144_vm0, %v592_v52  ;;  %720 = vst.msk [vmem:[#allocation2 + $0x1f0] sm:$0xff] %vm144_vm0, %v591_v55  ;;  %v593_v0 = vmax.f32 %v337_v57, %v465_v59  ;;  %v817_v3 = vld [vmem:[#allocation2 + $0xe0] sm:$0xff]  ;;  %v596_v4 = vmax.f32 %v340_v60, %v468_v1  ;;  %v467_v5 = vld [vmem:[%s1860_s13 + $0x210] sm:$0xff] }
  0x72   : > { %723 = vst.msk [vmem:[#allocation2 + $0x208] sm:$0xff] %vm144_vm0, %v594_v58  ;;  %v342_v6 = vld [vmem:[#allocation2 + $0x228] sm:$0xff]  ;;  %v595_v7 = vmax.f32 %v339_v2, %v467_v5  ;;  %v341_v9 = vld [vmem:[#allocation2 + $0x220] sm:$0xff]  ;;  %v344_v12 = vld [vmem:[#allocation2 + $0x238] sm:$0xff] }
  0x73   : > { %722 = vst.msk [vmem:[#allocation2 + $0x200] sm:$0xff] %vm144_vm0, %v593_v0  ;;  %v470_v8 = vld [vmem:[%s1860_s13 + $0x228] sm:$0xff]  ;;  %725 = vst.msk [vmem:[#allocation2 + $0x218] sm:$0xff] %vm144_vm0, %v596_v4  ;;  %v469_v11 = vld [vmem:[%s1860_s13 + $0x220] sm:$0xff] }
  0x74   : > { %975 = vmax.xlane.f32.xlu1 %v974_v61  ;;  %972 = vmax.xlane.f32.xlu0 %v971_v62  ;;  %v998_v61 = vsel %vm144_vm0, %v816_v47, -inf  ;;  %v995_v62 = vsel %vm144_vm0, %v815_v51, -inf  ;;  %v598_v10 = vmax.f32 %v342_v6, %v470_v8  ;;  %v820_v15 = vld [vmem:[#allocation2 + $0xf8] sm:$0xff]  ;;  %724 = vst.msk [vmem:[#allocation2 + $0x210] sm:$0xff] %vm144_vm0, %v595_v7  ;;  %v597_v16 = vmax.f32 %v341_v9, %v469_v11  ;;  %v343_v18 = vld [vmem:[#allocation2 + $0x230] sm:$0xff]  ;;  %v346_v22 = vld [vmem:[#allocation2 + $0x248] sm:$0xff] }
  0x75   : > { %v472_v17 = vld [vmem:[%s1860_s13 + $0x238] sm:$0xff]  ;;  %v819_v19 = vld [vmem:[#allocation2 + $0xf0] sm:$0xff]  ;;  %v474_v24 = vld [vmem:[%s1860_s13 + $0x248] sm:$0xff] }
  0x76   : > { %727 = vst.msk [vmem:[#allocation2 + $0x228] sm:$0xff] %vm144_vm0, %v598_v10  ;;  %v600_v20 = vmax.f32 %v344_v12, %v472_v17  ;;  %v471_v21 = vld [vmem:[%s1860_s13 + $0x230] sm:$0xff]  ;;  %726 = vst.msk [vmem:[#allocation2 + $0x220] sm:$0xff] %vm144_vm0, %v597_v16  ;;  %v345_v25 = vld [vmem:[#allocation2 + $0x240] sm:$0xff]  ;;  %v602_v26 = vmax.f32 %v346_v22, %v474_v24 }
  0x77   : > { %v599_v23 = vmax.f32 %v343_v18, %v471_v21  ;;  %v473_v27 = vld [vmem:[%s1860_s13 + $0x240] sm:$0xff]  ;;  %v348_v28 = vld [vmem:[#allocation2 + $0x258] sm:$0xff]  ;;  %v822_v31 = vld [vmem:[#allocation2 + $0x108] sm:$0xff] }
  0x78   : > { %981 = vmax.xlane.f32.xlu1 %v980_v13  ;;  %978 = vmax.xlane.f32.xlu0 %v977_v14  ;;  %v1004_v13 = vsel %vm144_vm0, %v818_v63, -inf  ;;  %v1001_v14 = vsel %vm144_vm0, %v817_v3, -inf  ;;  %729 = vst.msk [vmem:[#allocation2 + $0x238] sm:$0xff] %vm144_vm0, %v600_v20  ;;  %v601_v32 = vmax.f32 %v345_v25, %v473_v27  ;;  %v476_v33 = vld [vmem:[%s1860_s13 + $0x258] sm:$0xff]  ;;  %v347_v34 = vld [vmem:[#allocation2 + $0x250] sm:$0xff]  ;;  %v821_v35 = vld [vmem:[#allocation2 + $0x100] sm:$0xff] }
  0x79   : > { %728 = vst.msk [vmem:[#allocation2 + $0x230] sm:$0xff] %vm144_vm0, %v599_v23  ;;  %731 = vst.msk [vmem:[#allocation2 + $0x248] sm:$0xff] %vm144_vm0, %v602_v26  ;;  %v604_v36 = vmax.f32 %v348_v28, %v476_v33  ;;  %v475_v37 = vld [vmem:[%s1860_s13 + $0x250] sm:$0xff]  ;;  %v350_v38 = vld [vmem:[#allocation2 + $0x268] sm:$0xff] }
  0x7a   : > { %730 = vst.msk [vmem:[#allocation2 + $0x240] sm:$0xff] %vm144_vm0, %v601_v32  ;;  %v603_v39 = vmax.f32 %v347_v34, %v475_v37  ;;  %v478_v40 = vld [vmem:[%s1860_s13 + $0x268] sm:$0xff]  ;;  %v349_v41 = vld [vmem:[#allocation2 + $0x260] sm:$0xff]  ;;  %v352_v44 = vld [vmem:[#allocation2 + $0x278] sm:$0xff] }
  0x7b   : > { %733 = vst.msk [vmem:[#allocation2 + $0x258] sm:$0xff] %vm144_vm0, %v604_v36  ;;  %v606_v42 = vmax.f32 %v350_v38, %v478_v40  ;;  %v477_v43 = vld [vmem:[%s1860_s13 + $0x260] sm:$0xff]  ;;  %v824_v47 = vld [vmem:[#allocation2 + $0x118] sm:$0xff]  ;;  %v351_v50 = vld [vmem:[#allocation2 + $0x270] sm:$0xff] }
  0x7c   : > { %987 = vmax.xlane.f32.xlu1 %v986_v29  ;;  %984 = vmax.xlane.f32.xlu0 %v983_v30  ;;  %v1010_v29 = vsel %vm144_vm0, %v820_v15, -inf  ;;  %v1007_v30 = vsel %vm144_vm0, %v819_v19, -inf  ;;  %732 = vst.msk [vmem:[#allocation2 + $0x250] sm:$0xff] %vm144_vm0, %v603_v39  ;;  %v605_v48 = vmax.f32 %v349_v41, %v477_v43  ;;  %v480_v49 = vld [vmem:[%s1860_s13 + $0x278] sm:$0xff]  ;;  %v823_v51 = vld [vmem:[#allocation2 + $0x110] sm:$0xff]  ;;  %v354_v54 = vld [vmem:[#allocation2 + $0x288] sm:$0xff] }
  0x7d   : > { %735 = vst.msk [vmem:[#allocation2 + $0x268] sm:$0xff] %vm144_vm0, %v606_v42  ;;  %v608_v52 = vmax.f32 %v352_v44, %v480_v49  ;;  %v479_v53 = vld [vmem:[%s1860_s13 + $0x270] sm:$0xff]  ;;  %v482_v56 = vld [vmem:[%s1860_s13 + $0x288] sm:$0xff]  ;;  %v353_v57 = vld [vmem:[#allocation2 + $0x280] sm:$0xff] }
  0x7e   : > { %734 = vst.msk [vmem:[#allocation2 + $0x260] sm:$0xff] %vm144_vm0, %v605_v48  ;;  %v607_v55 = vmax.f32 %v351_v50, %v479_v53  ;;  %v610_v58 = vmax.f32 %v354_v54, %v482_v56  ;;  %v481_v59 = vld [vmem:[%s1860_s13 + $0x280] sm:$0xff]  ;;  %v356_v60 = vld [vmem:[#allocation2 + $0x298] sm:$0xff]  ;;  %v826_v63 = vld [vmem:[#allocation2 + $0x128] sm:$0xff] }
  0x7f   : > { %737 = vst.msk [vmem:[#allocation2 + $0x278] sm:$0xff] %vm144_vm0, %v608_v52  ;;  %v609_v0 = vmax.f32 %v353_v57, %v481_v59  ;;  %v484_v1 = vld [vmem:[%s1860_s13 + $0x298] sm:$0xff]  ;;  %v355_v2 = vld [vmem:[#allocation2 + $0x290] sm:$0xff]  ;;  %v825_v3 = vld [vmem:[#allocation2 + $0x120] sm:$0xff] }
  0x80   : > { %993 = vmax.xlane.f32.xlu1 %v992_v45  ;;  %990 = vmax.xlane.f32.xlu0 %v989_v46  ;;  %v1016_v45 = vsel %vm144_vm0, %v822_v31, -inf  ;;  %v1013_v46 = vsel %vm144_vm0, %v821_v35, -inf  ;;  %736 = vst.msk [vmem:[#allocation2 + $0x270] sm:$0xff] %vm144_vm0, %v607_v55  ;;  %739 = vst.msk [vmem:[#allocation2 + $0x288] sm:$0xff] %vm144_vm0, %v610_v58  ;;  %v612_v4 = vmax.f32 %v356_v60, %v484_v1  ;;  %v483_v5 = vld [vmem:[%s1860_s13 + $0x290] sm:$0xff]  ;;  %v358_v6 = vld [vmem:[#allocation2 + $0x2a8] sm:$0xff] }
  0x81   : > { %738 = vst.msk [vmem:[#allocation2 + $0x280] sm:$0xff] %vm144_vm0, %v609_v0  ;;  %v611_v7 = vmax.f32 %v355_v2, %v483_v5  ;;  %v486_v8 = vld [vmem:[%s1860_s13 + $0x2a8] sm:$0xff]  ;;  %v357_v9 = vld [vmem:[#allocation2 + $0x2a0] sm:$0xff]  ;;  %v360_v12 = vld [vmem:[#allocation2 + $0x2b8] sm:$0xff] }
  0x82   : > { %741 = vst.msk [vmem:[#allocation2 + $0x298] sm:$0xff] %vm144_vm0, %v612_v4  ;;  %v614_v10 = vmax.f32 %v358_v6, %v486_v8  ;;  %v485_v11 = vld [vmem:[%s1860_s13 + $0x2a0] sm:$0xff]  ;;  %v828_v15 = vld [vmem:[#allocation2 + $0x138] sm:$0xff]  ;;  %v359_v18 = vld [vmem:[#allocation2 + $0x2b0] sm:$0xff] }
  0x83   : > { %740 = vst.msk [vmem:[#allocation2 + $0x290] sm:$0xff] %vm144_vm0, %v611_v7  ;;  %v613_v16 = vmax.f32 %v357_v9, %v485_v11  ;;  %v488_v17 = vld [vmem:[%s1860_s13 + $0x2b8] sm:$0xff]  ;;  %v827_v19 = vld [vmem:[#allocation2 + $0x130] sm:$0xff]  ;;  %v362_v22 = vld [vmem:[#allocation2 + $0x2c8] sm:$0xff] }
  0x84   : > { %999 = vmax.xlane.f32.xlu1 %v998_v61  ;;  %996 = vmax.xlane.f32.xlu0 %v995_v62  ;;  %v1022_v61 = vsel %vm144_vm0, %v824_v47, -inf  ;;  %v1019_v62 = vsel %vm144_vm0, %v823_v51, -inf  ;;  %743 = vst.msk [vmem:[#allocation2 + $0x2a8] sm:$0xff] %vm144_vm0, %v614_v10  ;;  %v616_v20 = vmax.f32 %v360_v12, %v488_v17  ;;  %v487_v21 = vld [vmem:[%s1860_s13 + $0x2b0] sm:$0xff]  ;;  %v490_v24 = vld [vmem:[%s1860_s13 + $0x2c8] sm:$0xff]  ;;  %v361_v25 = vld [vmem:[#allocation2 + $0x2c0] sm:$0xff] }
  0x85   : > { %742 = vst.msk [vmem:[#allocation2 + $0x2a0] sm:$0xff] %vm144_vm0, %v613_v16  ;;  %v615_v23 = vmax.f32 %v359_v18, %v487_v21  ;;  %v618_v26 = vmax.f32 %v362_v22, %v490_v24  ;;  %v489_v27 = vld [vmem:[%s1860_s13 + $0x2c0] sm:$0xff]  ;;  %v364_v28 = vld [vmem:[#allocation2 + $0x2d8] sm:$0xff]  ;;  %v830_v31 = vld [vmem:[#allocation2 + $0x148] sm:$0xff] }
  0x86   : > { %745 = vst.msk [vmem:[#allocation2 + $0x2b8] sm:$0xff] %vm144_vm0, %v616_v20  ;;  %v617_v32 = vmax.f32 %v361_v25, %v489_v27  ;;  %v492_v33 = vld [vmem:[%s1860_s13 + $0x2d8] sm:$0xff]  ;;  %v363_v34 = vld [vmem:[#allocation2 + $0x2d0] sm:$0xff]  ;;  %v829_v35 = vld [vmem:[#allocation2 + $0x140] sm:$0xff] }
  0x87   : > { %744 = vst.msk [vmem:[#allocation2 + $0x2b0] sm:$0xff] %vm144_vm0, %v615_v23  ;;  %747 = vst.msk [vmem:[#allocation2 + $0x2c8] sm:$0xff] %vm144_vm0, %v618_v26  ;;  %v620_v36 = vmax.f32 %v364_v28, %v492_v33  ;;  %v491_v37 = vld [vmem:[%s1860_s13 + $0x2d0] sm:$0xff]  ;;  %v366_v38 = vld [vmem:[#allocation2 + $0x2e8] sm:$0xff] }
  0x88   : > { %1005 = vmax.xlane.f32.xlu1 %v1004_v13  ;;  %1002 = vmax.xlane.f32.xlu0 %v1001_v14  ;;  %v1028_v13 = vsel %vm144_vm0, %v826_v63, -inf  ;;  %v1025_v14 = vsel %vm144_vm0, %v825_v3, -inf  ;;  %746 = vst.msk [vmem:[#allocation2 + $0x2c0] sm:$0xff] %vm144_vm0, %v617_v32  ;;  %v619_v39 = vmax.f32 %v363_v34, %v491_v37  ;;  %v494_v40 = vld [vmem:[%s1860_s13 + $0x2e8] sm:$0xff]  ;;  %v365_v41 = vld [vmem:[#allocation2 + $0x2e0] sm:$0xff]  ;;  %v368_v44 = vld [vmem:[#allocation2 + $0x2f8] sm:$0xff] }
  0x89   : > { %749 = vst.msk [vmem:[#allocation2 + $0x2d8] sm:$0xff] %vm144_vm0, %v620_v36  ;;  %v622_v42 = vmax.f32 %v366_v38, %v494_v40  ;;  %v493_v43 = vld [vmem:[%s1860_s13 + $0x2e0] sm:$0xff]  ;;  %v832_v47 = vld [vmem:[#allocation2 + $0x158] sm:$0xff]  ;;  %v367_v50 = vld [vmem:[#allocation2 + $0x2f0] sm:$0xff] }
  0x8a   : > { %748 = vst.msk [vmem:[#allocation2 + $0x2d0] sm:$0xff] %vm144_vm0, %v619_v39  ;;  %v621_v48 = vmax.f32 %v365_v41, %v493_v43  ;;  %v496_v49 = vld [vmem:[%s1860_s13 + $0x2f8] sm:$0xff]  ;;  %v831_v51 = vld [vmem:[#allocation2 + $0x150] sm:$0xff]  ;;  %v370_v54 = vld [vmem:[#allocation2 + $0x308] sm:$0xff] }
  0x8b   : > { %751 = vst.msk [vmem:[#allocation2 + $0x2e8] sm:$0xff] %vm144_vm0, %v622_v42  ;;  %v624_v52 = vmax.f32 %v368_v44, %v496_v49  ;;  %v495_v53 = vld [vmem:[%s1860_s13 + $0x2f0] sm:$0xff]  ;;  %v498_v56 = vld [vmem:[%s1860_s13 + $0x308] sm:$0xff]  ;;  %v369_v57 = vld [vmem:[#allocation2 + $0x300] sm:$0xff] }
  0x8c   : > { %1011 = vmax.xlane.f32.xlu1 %v1010_v29  ;;  %1008 = vmax.xlane.f32.xlu0 %v1007_v30  ;;  %v1034_v29 = vsel %vm144_vm0, %v828_v15, -inf  ;;  %v1031_v30 = vsel %vm144_vm0, %v827_v19, -inf  ;;  %750 = vst.msk [vmem:[#allocation2 + $0x2e0] sm:$0xff] %vm144_vm0, %v621_v48  ;;  %v623_v55 = vmax.f32 %v367_v50, %v495_v53  ;;  %v626_v58 = vmax.f32 %v370_v54, %v498_v56  ;;  %v497_v59 = vld [vmem:[%s1860_s13 + $0x300] sm:$0xff]  ;;  %v372_v60 = vld [vmem:[#allocation2 + $0x318] sm:$0xff]  ;;  %v834_v63 = vld [vmem:[#allocation2 + $0x168] sm:$0xff] }
  0x8d   : > { %753 = vst.msk [vmem:[#allocation2 + $0x2f8] sm:$0xff] %vm144_vm0, %v624_v52  ;;  %v625_v0 = vmax.f32 %v369_v57, %v497_v59  ;;  %v500_v1 = vld [vmem:[%s1860_s13 + $0x318] sm:$0xff]  ;;  %v371_v2 = vld [vmem:[#allocation2 + $0x310] sm:$0xff]  ;;  %v833_v3 = vld [vmem:[#allocation2 + $0x160] sm:$0xff] }
  0x8e   : > { %752 = vst.msk [vmem:[#allocation2 + $0x2f0] sm:$0xff] %vm144_vm0, %v623_v55  ;;  %755 = vst.msk [vmem:[#allocation2 + $0x308] sm:$0xff] %vm144_vm0, %v626_v58  ;;  %v628_v4 = vmax.f32 %v372_v60, %v500_v1  ;;  %v499_v5 = vld [vmem:[%s1860_s13 + $0x310] sm:$0xff]  ;;  %v374_v6 = vld [vmem:[#allocation2 + $0x328] sm:$0xff] }
  0x8f   : > { %754 = vst.msk [vmem:[#allocation2 + $0x300] sm:$0xff] %vm144_vm0, %v625_v0  ;;  %v627_v7 = vmax.f32 %v371_v2, %v499_v5  ;;  %v502_v8 = vld [vmem:[%s1860_s13 + $0x328] sm:$0xff]  ;;  %v373_v9 = vld [vmem:[#allocation2 + $0x320] sm:$0xff]  ;;  %v376_v12 = vld [vmem:[#allocation2 + $0x338] sm:$0xff] }
  0x90   : > { %1017 = vmax.xlane.f32.xlu1 %v1016_v45  ;;  %1014 = vmax.xlane.f32.xlu0 %v1013_v46  ;;  %v1040_v45 = vsel %vm144_vm0, %v830_v31, -inf  ;;  %v1037_v46 = vsel %vm144_vm0, %v829_v35, -inf  ;;  %757 = vst.msk [vmem:[#allocation2 + $0x318] sm:$0xff] %vm144_vm0, %v628_v4  ;;  %v630_v10 = vmax.f32 %v374_v6, %v502_v8  ;;  %v501_v11 = vld [vmem:[%s1860_s13 + $0x320] sm:$0xff]  ;;  %v836_v15 = vld [vmem:[#allocation2 + $0x178] sm:$0xff]  ;;  %v375_v18 = vld [vmem:[#allocation2 + $0x330] sm:$0xff] }
  0x91   : > { %756 = vst.msk [vmem:[#allocation2 + $0x310] sm:$0xff] %vm144_vm0, %v627_v7  ;;  %v629_v16 = vmax.f32 %v373_v9, %v501_v11  ;;  %v504_v17 = vld [vmem:[%s1860_s13 + $0x338] sm:$0xff]  ;;  %v835_v19 = vld [vmem:[#allocation2 + $0x170] sm:$0xff]  ;;  %v378_v22 = vld [vmem:[#allocation2 + $0x348] sm:$0xff] }
  0x92   : > { %759 = vst.msk [vmem:[#allocation2 + $0x328] sm:$0xff] %vm144_vm0, %v630_v10  ;;  %v632_v20 = vmax.f32 %v376_v12, %v504_v17  ;;  %v503_v21 = vld [vmem:[%s1860_s13 + $0x330] sm:$0xff]  ;;  %v506_v24 = vld [vmem:[%s1860_s13 + $0x348] sm:$0xff]  ;;  %v377_v25 = vld [vmem:[#allocation2 + $0x340] sm:$0xff] }
  0x93   : > { %758 = vst.msk [vmem:[#allocation2 + $0x320] sm:$0xff] %vm144_vm0, %v629_v16  ;;  %v631_v23 = vmax.f32 %v375_v18, %v503_v21  ;;  %v634_v26 = vmax.f32 %v378_v22, %v506_v24  ;;  %v505_v27 = vld [vmem:[%s1860_s13 + $0x340] sm:$0xff]  ;;  %v380_v28 = vld [vmem:[#allocation2 + $0x358] sm:$0xff]  ;;  %v838_v31 = vld [vmem:[#allocation2 + $0x188] sm:$0xff] }
  0x94   : > { %1023 = vmax.xlane.f32.xlu1 %v1022_v61  ;;  %1020 = vmax.xlane.f32.xlu0 %v1019_v62  ;;  %v1046_v61 = vsel %vm144_vm0, %v832_v47, -inf  ;;  %v1043_v62 = vsel %vm144_vm0, %v831_v51, -inf  ;;  %761 = vst.msk [vmem:[#allocation2 + $0x338] sm:$0xff] %vm144_vm0, %v632_v20  ;;  %v633_v32 = vmax.f32 %v377_v25, %v505_v27  ;;  %v508_v33 = vld [vmem:[%s1860_s13 + $0x358] sm:$0xff]  ;;  %v379_v34 = vld [vmem:[#allocation2 + $0x350] sm:$0xff]  ;;  %v837_v35 = vld [vmem:[#allocation2 + $0x180] sm:$0xff] }
  0x95   : > { %760 = vst.msk [vmem:[#allocation2 + $0x330] sm:$0xff] %vm144_vm0, %v631_v23  ;;  %763 = vst.msk [vmem:[#allocation2 + $0x348] sm:$0xff] %vm144_vm0, %v634_v26  ;;  %v636_v36 = vmax.f32 %v380_v28, %v508_v33  ;;  %v507_v37 = vld [vmem:[%s1860_s13 + $0x350] sm:$0xff]  ;;  %v382_v38 = vld [vmem:[#allocation2 + $0x368] sm:$0xff] }
  0x96   : > { %762 = vst.msk [vmem:[#allocation2 + $0x340] sm:$0xff] %vm144_vm0, %v633_v32  ;;  %v635_v39 = vmax.f32 %v379_v34, %v507_v37  ;;  %v510_v40 = vld [vmem:[%s1860_s13 + $0x368] sm:$0xff]  ;;  %v381_v41 = vld [vmem:[#allocation2 + $0x360] sm:$0xff]  ;;  %v384_v44 = vld [vmem:[#allocation2 + $0x378] sm:$0xff] }
  0x97   : > { %765 = vst.msk [vmem:[#allocation2 + $0x358] sm:$0xff] %vm144_vm0, %v636_v36  ;;  %v638_v42 = vmax.f32 %v382_v38, %v510_v40  ;;  %v509_v43 = vld [vmem:[%s1860_s13 + $0x360] sm:$0xff]  ;;  %v840_v47 = vld [vmem:[#allocation2 + $0x198] sm:$0xff]  ;;  %v383_v50 = vld [vmem:[#allocation2 + $0x370] sm:$0xff] }
  0x98   : > { %1029 = vmax.xlane.f32.xlu1 %v1028_v13  ;;  %1026 = vmax.xlane.f32.xlu0 %v1025_v14  ;;  %v1052_v13 = vsel %vm144_vm0, %v834_v63, -inf  ;;  %v1049_v14 = vsel %vm144_vm0, %v833_v3, -inf  ;;  %764 = vst.msk [vmem:[#allocation2 + $0x350] sm:$0xff] %vm144_vm0, %v635_v39  ;;  %v637_v48 = vmax.f32 %v381_v41, %v509_v43  ;;  %v512_v49 = vld [vmem:[%s1860_s13 + $0x378] sm:$0xff]  ;;  %v839_v51 = vld [vmem:[#allocation2 + $0x190] sm:$0xff]  ;;  %v386_v54 = vld [vmem:[#allocation2 + $0x388] sm:$0xff] }
  0x99   : > { %767 = vst.msk [vmem:[#allocation2 + $0x368] sm:$0xff] %vm144_vm0, %v638_v42  ;;  %v640_v52 = vmax.f32 %v384_v44, %v512_v49  ;;  %v511_v53 = vld [vmem:[%s1860_s13 + $0x370] sm:$0xff]  ;;  %v514_v56 = vld [vmem:[%s1860_s13 + $0x388] sm:$0xff]  ;;  %v385_v57 = vld [vmem:[#allocation2 + $0x380] sm:$0xff] }
  0x9a   : > { %766 = vst.msk [vmem:[#allocation2 + $0x360] sm:$0xff] %vm144_vm0, %v637_v48  ;;  %v639_v55 = vmax.f32 %v383_v50, %v511_v53  ;;  %v642_v58 = vmax.f32 %v386_v54, %v514_v56  ;;  %v513_v59 = vld [vmem:[%s1860_s13 + $0x380] sm:$0xff]  ;;  %v388_v60 = vld [vmem:[#allocation2 + $0x398] sm:$0xff]  ;;  %v842_v63 = vld [vmem:[#allocation2 + $0x1a8] sm:$0xff] }
  0x9b   : > { %769 = vst.msk [vmem:[#allocation2 + $0x378] sm:$0xff] %vm144_vm0, %v640_v52  ;;  %v641_v0 = vmax.f32 %v385_v57, %v513_v59  ;;  %v516_v1 = vld [vmem:[%s1860_s13 + $0x398] sm:$0xff]  ;;  %v387_v2 = vld [vmem:[#allocation2 + $0x390] sm:$0xff]  ;;  %v841_v3 = vld [vmem:[#allocation2 + $0x1a0] sm:$0xff] }
  0x9c   : > { %1035 = vmax.xlane.f32.xlu1 %v1034_v29  ;;  %1032 = vmax.xlane.f32.xlu0 %v1031_v30  ;;  %v1058_v29 = vsel %vm144_vm0, %v836_v15, -inf  ;;  %v1055_v30 = vsel %vm144_vm0, %v835_v19, -inf  ;;  %768 = vst.msk [vmem:[#allocation2 + $0x370] sm:$0xff] %vm144_vm0, %v639_v55  ;;  %771 = vst.msk [vmem:[#allocation2 + $0x388] sm:$0xff] %vm144_vm0, %v642_v58  ;;  %v644_v4 = vmax.f32 %v388_v60, %v516_v1  ;;  %v515_v5 = vld [vmem:[%s1860_s13 + $0x390] sm:$0xff]  ;;  %v390_v6 = vld [vmem:[#allocation2 + $0x3a8] sm:$0xff] }
  0x9d   : > { %770 = vst.msk [vmem:[#allocation2 + $0x380] sm:$0xff] %vm144_vm0, %v641_v0  ;;  %v643_v7 = vmax.f32 %v387_v2, %v515_v5  ;;  %v518_v8 = vld [vmem:[%s1860_s13 + $0x3a8] sm:$0xff]  ;;  %v389_v9 = vld [vmem:[#allocation2 + $0x3a0] sm:$0xff]  ;;  %v392_v12 = vld [vmem:[#allocation2 + $0x3b8] sm:$0xff] }
  0x9e   : > { %773 = vst.msk [vmem:[#allocation2 + $0x398] sm:$0xff] %vm144_vm0, %v644_v4  ;;  %v646_v10 = vmax.f32 %v390_v6, %v518_v8  ;;  %v517_v11 = vld [vmem:[%s1860_s13 + $0x3a0] sm:$0xff]  ;;  %v844_v15 = vld [vmem:[#allocation2 + $0x1b8] sm:$0xff]  ;;  %v391_v18 = vld [vmem:[#allocation2 + $0x3b0] sm:$0xff] }
  0x9f   : > { %772 = vst.msk [vmem:[#allocation2 + $0x390] sm:$0xff] %vm144_vm0, %v643_v7  ;;  %v645_v16 = vmax.f32 %v389_v9, %v517_v11  ;;  %v520_v17 = vld [vmem:[%s1860_s13 + $0x3b8] sm:$0xff]  ;;  %v843_v19 = vld [vmem:[#allocation2 + $0x1b0] sm:$0xff]  ;;  %v394_v22 = vld [vmem:[#allocation2 + $0x3c8] sm:$0xff] }
  0xa0   : > { %1041 = vmax.xlane.f32.xlu1 %v1040_v45  ;;  %1038 = vmax.xlane.f32.xlu0 %v1037_v46  ;;  %v1064_v45 = vsel %vm144_vm0, %v838_v31, -inf  ;;  %v1061_v46 = vsel %vm144_vm0, %v837_v35, -inf  ;;  %775 = vst.msk [vmem:[#allocation2 + $0x3a8] sm:$0xff] %vm144_vm0, %v646_v10  ;;  %v648_v20 = vmax.f32 %v392_v12, %v520_v17  ;;  %v519_v21 = vld [vmem:[%s1860_s13 + $0x3b0] sm:$0xff]  ;;  %v522_v24 = vld [vmem:[%s1860_s13 + $0x3c8] sm:$0xff]  ;;  %v393_v25 = vld [vmem:[#allocation2 + $0x3c0] sm:$0xff] }
  0xa1   : > { %774 = vst.msk [vmem:[#allocation2 + $0x3a0] sm:$0xff] %vm144_vm0, %v645_v16  ;;  %v647_v23 = vmax.f32 %v391_v18, %v519_v21  ;;  %v650_v26 = vmax.f32 %v394_v22, %v522_v24  ;;  %v521_v27 = vld [vmem:[%s1860_s13 + $0x3c0] sm:$0xff]  ;;  %v396_v28 = vld [vmem:[#allocation2 + $0x3d8] sm:$0xff]  ;;  %v395_v33 = vld [vmem:[#allocation2 + $0x3d0] sm:$0xff] }
  0xa2   : > { %777 = vst.msk [vmem:[#allocation2 + $0x3b8] sm:$0xff] %vm144_vm0, %v648_v20  ;;  %v649_v31 = vmax.f32 %v393_v25, %v521_v27  ;;  %v524_v32 = vld [vmem:[%s1860_s13 + $0x3d8] sm:$0xff]  ;;  %v846_v34 = vld [vmem:[#allocation2 + $0x1c8] sm:$0xff]  ;;  %v845_v35 = vld [vmem:[#allocation2 + $0x1c0] sm:$0xff] }
  0xa3   : > { %776 = vst.msk [vmem:[#allocation2 + $0x3b0] sm:$0xff] %vm144_vm0, %v647_v23  ;;  %779 = vst.msk [vmem:[#allocation2 + $0x3c8] sm:$0xff] %vm144_vm0, %v650_v26  ;;  %v652_v36 = vmax.f32 %v396_v28, %v524_v32  ;;  %v523_v37 = vld [vmem:[%s1860_s13 + $0x3d0] sm:$0xff]  ;;  %v398_v39 = vld [vmem:[#allocation2 + $0x3e8] sm:$0xff]  ;;  %v1088_v41 = vsel %vm144_vm0, %v846_v34, -inf  ;;  %v1085_v42 = vsel %vm144_vm0, %v845_v35, -inf }
  0xa4   : > { %1047 = vmax.xlane.f32.xlu1 %v1046_v61  ;;  %1044 = vmax.xlane.f32.xlu0 %v1043_v62  ;;  %v1070_v61 = vsel %vm144_vm0, %v840_v47, -inf  ;;  %v1067_v62 = vsel %vm144_vm0, %v839_v51, -inf  ;;  %778 = vst.msk [vmem:[#allocation2 + $0x3c0] sm:$0xff] %vm144_vm0, %v649_v31  ;;  %v651_v38 = vmax.f32 %v395_v33, %v523_v37  ;;  %v526_v40 = vld [vmem:[%s1860_s13 + $0x3e8] sm:$0xff]  ;;  %v397_v44 = vld [vmem:[#allocation2 + $0x3e0] sm:$0xff]  ;;  %v847_v47 = vld [vmem:[#allocation2 + $0x1d0] sm:$0xff] }
  0xa5   : > { %781 = vst.msk [vmem:[#allocation2 + $0x3d8] sm:$0xff] %vm144_vm0, %v652_v36  ;;  %v654_v43 = vmax.f32 %v398_v39, %v526_v40  ;;  %v400_v49 = vld [vmem:[#allocation2 + $0x3f8] sm:$0xff]  ;;  %v1091_v52 = vsel %vm144_vm0, %v847_v47, -inf  ;;  %v399_v54 = vld [vmem:[#allocation2 + $0x3f0] sm:$0xff]  ;;  %v850_v56 = vld [vmem:[#allocation2 + $0x1e8] sm:$0xff] }
  0xa6   : > { %780 = vst.msk [vmem:[#allocation2 + $0x3d0] sm:$0xff] %vm144_vm0, %v651_v38  ;;  %v528_v50 = vld [vmem:[%s1860_s13 + $0x3f8] sm:$0xff]  ;;  %v527_v55 = vld [vmem:[%s1860_s13 + $0x3f0] sm:$0xff]  ;;  %v849_v57 = vld [vmem:[#allocation2 + $0x1e0] sm:$0xff]  ;;  %v1100_v59 = vsel %vm144_vm0, %v850_v56, -inf }
  0xa7   : > { %783 = vst.msk [vmem:[#allocation2 + $0x3e8] sm:$0xff] %vm144_vm0, %v654_v43  ;;  %v656_v53 = vmax.f32 %v400_v49, %v528_v50  ;;  %v655_v58 = vmax.f32 %v399_v54, %v527_v55  ;;  %v1097_v60 = vsel %vm144_vm0, %v849_v57, -inf  ;;  %v854_v1 = vld [vmem:[#allocation2 + $0x208] sm:$0xff]  ;;  %v853_v2 = vld [vmem:[#allocation2 + $0x200] sm:$0xff]  ;;  %v856_v5 = vld [vmem:[#allocation2 + $0x218] sm:$0xff] }
  0xa8   : > { %1053 = vmax.xlane.f32.xlu1 %v1052_v13  ;;  %1050 = vmax.xlane.f32.xlu0 %v1049_v14  ;;  %v1076_v13 = vsel %vm144_vm0, %v842_v63, -inf  ;;  %v1073_v14 = vsel %vm144_vm0, %v841_v3, -inf  ;;  %v1112_v3 = vsel %vm144_vm0, %v854_v1, -inf  ;;  %v1109_v4 = vsel %vm144_vm0, %v853_v2, -inf  ;;  %v855_v6 = vld [vmem:[#allocation2 + $0x210] sm:$0xff]  ;;  %v858_v9 = vld [vmem:[#allocation2 + $0x228] sm:$0xff] }
  0xa9   : > { %785 = vst.msk [vmem:[#allocation2 + $0x3f8] sm:$0xff] %vm144_vm0, %v656_v53  ;;  %784 = vst.msk [vmem:[#allocation2 + $0x3f0] sm:$0xff] %vm144_vm0, %v655_v58  ;;  %v1118_v7 = vsel %vm144_vm0, %v856_v5, -inf  ;;  %v1115_v8 = vsel %vm144_vm0, %v855_v6, -inf  ;;  %v857_v10 = vld [vmem:[#allocation2 + $0x220] sm:$0xff]  ;;  %v1124_v11 = vsel %vm144_vm0, %v858_v9, -inf }
  0xaa   : > { %v1121_v12 = vsel %vm144_vm0, %v857_v10, -inf  ;;  %v862_v17 = vld [vmem:[#allocation2 + $0x248] sm:$0xff]  ;;  %v861_v18 = vld [vmem:[#allocation2 + $0x240] sm:$0xff]  ;;  %v864_v23 = vld [vmem:[#allocation2 + $0x258] sm:$0xff] }
  0xab   : > { %v1136_v21 = vsel %vm144_vm0, %v862_v17, -inf  ;;  %v1133_v22 = vsel %vm144_vm0, %v861_v18, -inf  ;;  %v863_v24 = vld [vmem:[#allocation2 + $0x250] sm:$0xff]  ;;  %v1142_v27 = vsel %vm144_vm0, %v864_v23, -inf  ;;  %v868_v35 = vld [vmem:[#allocation2 + $0x278] sm:$0xff]  ;;  %v874_v53 = vld [vmem:[#allocation2 + $0x2a8] sm:$0xff] }
  0xac   : > { %1059 = vmax.xlane.f32.xlu1 %v1058_v29  ;;  %1056 = vmax.xlane.f32.xlu0 %v1055_v30  ;;  %v1082_v29 = vsel %vm144_vm0, %v844_v15, -inf  ;;  %v1079_v30 = vsel %vm144_vm0, %v843_v19, -inf  ;;  %v1139_v28 = vsel %vm144_vm0, %v863_v24, -inf  ;;  %v867_v36 = vld [vmem:[#allocation2 + $0x270] sm:$0xff]  ;;  %v1154_v39 = vsel %vm144_vm0, %v868_v35, -inf  ;;  %v872_v47 = vld [vmem:[#allocation2 + $0x298] sm:$0xff] }
  0xad   : > { %v1151_v40 = vsel %vm144_vm0, %v867_v36, -inf  ;;  %v873_v54 = vld [vmem:[#allocation2 + $0x2a0] sm:$0xff]  ;;  %v1172_v57 = vsel %vm144_vm0, %v874_v53, -inf  ;;  %v878_v1 = vld [vmem:[#allocation2 + $0x2c8] sm:$0xff] }
  0xae   : > { %v1169_v58 = vsel %vm144_vm0, %v873_v54, -inf  ;;  %v877_v2 = vld [vmem:[#allocation2 + $0x2c0] sm:$0xff]  ;;  %v1184_v5 = vsel %vm144_vm0, %v878_v1, -inf }
  0xaf   : > { %v1181_v6 = vsel %vm144_vm0, %v877_v2, -inf }
  0xb0   : > { %1065 = vmax.xlane.f32.xlu1 %v1064_v45  ;;  %1062 = vmax.xlane.f32.xlu0 %v1061_v46  ;;  %v525_v45 = vld [vmem:[%s1860_s13 + $0x3e0] sm:$0xff]  ;;  %v848_v46 = vld [vmem:[#allocation2 + $0x1d8] sm:$0xff] }
  0xb1   : > { %v653_v48 = vmax.f32 %v397_v44, %v525_v45  ;;  %v1094_v51 = vsel %vm144_vm0, %v848_v46, -inf }
  0xb3   : > { %782 = vst.msk [vmem:[#allocation2 + $0x3e0] sm:$0xff] %vm144_vm0, %v653_v48  ;;  %v871_v48 = vld [vmem:[#allocation2 + $0x290] sm:$0xff] }
  0xb4   : > { %1071 = vmax.xlane.f32.xlu1 %v1070_v61  ;;  %1068 = vmax.xlane.f32.xlu0 %v1067_v62  ;;  %v852_v61 = vld [vmem:[#allocation2 + $0x1f8] sm:$0xff]  ;;  %v851_v62 = vld [vmem:[#allocation2 + $0x1f0] sm:$0xff] }
  0xb5   : > { %v1106_v63 = vsel %vm144_vm0, %v852_v61, -inf  ;;  %v1103_v0 = vsel %vm144_vm0, %v851_v62, -inf }
  0xb8   : > { %1077 = vmax.xlane.f32.xlu1 %v1076_v13  ;;  %1074 = vmax.xlane.f32.xlu0 %v1073_v14  ;;  %v860_v13 = vld [vmem:[#allocation2 + $0x238] sm:$0xff]  ;;  %v859_v14 = vld [vmem:[#allocation2 + $0x230] sm:$0xff] }
  0xb9   : > { %v1130_v15 = vsel %vm144_vm0, %v860_v13, -inf  ;;  %v1127_v16 = vsel %vm144_vm0, %v859_v14, -inf  ;;  %v882_v13 = vld [vmem:[#allocation2 + $0x2e8] sm:$0xff]  ;;  %v881_v14 = vld [vmem:[#allocation2 + $0x2e0] sm:$0xff] }
  0xba   : > { %v1196_v17 = vsel %vm144_vm0, %v882_v13, -inf  ;;  %v1193_v18 = vsel %vm144_vm0, %v881_v14, -inf }
  0xbc   : > { %1083 = vmax.xlane.f32.xlu1 %v1082_v29  ;;  %1080 = vmax.xlane.f32.xlu0 %v1079_v30  ;;  %v866_v29 = vld [vmem:[#allocation2 + $0x268] sm:$0xff]  ;;  %v865_v30 = vld [vmem:[#allocation2 + $0x260] sm:$0xff] }
  0xbd   : > { %v1148_v33 = vsel %vm144_vm0, %v866_v29, -inf  ;;  %v1145_v34 = vsel %vm144_vm0, %v865_v30, -inf }
  0xc0   : > { %1089 = vmax.xlane.f32.xlu1 %v1088_v41  ;;  %1086 = vmax.xlane.f32.xlu0 %v1085_v42  ;;  %v870_v41 = vld [vmem:[#allocation2 + $0x288] sm:$0xff]  ;;  %v869_v42 = vld [vmem:[#allocation2 + $0x280] sm:$0xff] }
  0xc1   : > { %v1160_v45 = vsel %vm144_vm0, %v870_v41, -inf  ;;  %v1157_v46 = vsel %vm144_vm0, %v869_v42, -inf }
  0xc4   : > { %1095 = vmax.xlane.f32.xlu1 %v1094_v51  ;;  %1092 = vmax.xlane.f32.xlu0 %v1091_v52  ;;  %v1166_v51 = vsel %vm144_vm0, %v872_v47, -inf  ;;  %v1163_v52 = vsel %vm144_vm0, %v871_v48, -inf }
  0xc8   : > { %1101 = vmax.xlane.f32.xlu1 %v1100_v59  ;;  %1098 = vmax.xlane.f32.xlu0 %v1097_v60  ;;  %v876_v59 = vld [vmem:[#allocation2 + $0x2b8] sm:$0xff]  ;;  %v875_v60 = vld [vmem:[#allocation2 + $0x2b0] sm:$0xff] }
  0xcc   : > { %1107 = vmax.xlane.f32.xlu1 %v1106_v63  ;;  %1104 = vmax.xlane.f32.xlu0 %v1103_v0  ;;  %v1178_v63 = vsel %vm144_vm0, %v876_v59, -inf  ;;  %v1175_v0 = vsel %vm144_vm0, %v875_v60, -inf }
  0xd0   : > { %1113 = vmax.xlane.f32.xlu1 %v1112_v3  ;;  %1110 = vmax.xlane.f32.xlu0 %v1109_v4 }
  0xd4   : > { %1119 = vmax.xlane.f32.xlu1 %v1118_v7  ;;  %1116 = vmax.xlane.f32.xlu0 %v1115_v8  ;;  %v880_v7 = vld [vmem:[#allocation2 + $0x2d8] sm:$0xff]  ;;  %v879_v8 = vld [vmem:[#allocation2 + $0x2d0] sm:$0xff] }
  0xd8   : > { %1125 = vmax.xlane.f32.xlu1 %v1124_v11  ;;  %1122 = vmax.xlane.f32.xlu0 %v1121_v12  ;;  %v1190_v11 = vsel %vm144_vm0, %v880_v7, -inf  ;;  %v1187_v12 = vsel %vm144_vm0, %v879_v8, -inf }
  0xdc   : > { %1131 = vmax.xlane.f32.xlu1 %v1130_v15  ;;  %1128 = vmax.xlane.f32.xlu0 %v1127_v16 }
  0xdd   : > { %v925_v19 = vpop.xlane.xlu1 %924  ;;  %v919_v20 = vpop.xlane.xlu0 %918 }
  0xde   : > { %1304 = vst.msk [vmem:[%s2195_s16 + $0x10] sm:$0xff] %vm1301_vm1, %v925_v19  ;;  %1302 = vst.msk [vmem:[%s2195_s16] sm:$0xff] %vm1301_vm1, %v919_v20  ;;  %v884_v19 = vld [vmem:[#allocation2 + $0x2f8] sm:$0xff]  ;;  %v883_v20 = vld [vmem:[#allocation2 + $0x2f0] sm:$0xff] }
  0xdf   : > { %v1202_v23 = vsel %vm144_vm0, %v884_v19, -inf  ;;  %v1199_v24 = vsel %vm144_vm0, %v883_v20, -inf }
  0xe0   : > { %1137 = vmax.xlane.f32.xlu1 %v1136_v21  ;;  %1134 = vmax.xlane.f32.xlu0 %v1133_v22 }
  0xe1   : > { %v928_v25 = vpop.xlane.xlu1 %927  ;;  %v922_v26 = vpop.xlane.xlu0 %921 }
  0xe2   : > { %1305 = vst.msk [vmem:[%s2195_s16 + $0x18] sm:$0xff] %vm1301_vm1, %v928_v25  ;;  %1303 = vst.msk [vmem:[%s2195_s16 + $0x8] sm:$0xff] %vm1301_vm1, %v922_v26  ;;  %v886_v25 = vld [vmem:[#allocation2 + $0x308] sm:$0xff]  ;;  %v885_v26 = vld [vmem:[#allocation2 + $0x300] sm:$0xff] }
  0xe3   : > { %v1208_v29 = vsel %vm144_vm0, %v886_v25, -inf  ;;  %v1205_v30 = vsel %vm144_vm0, %v885_v26, -inf }
  0xe4   : > { %1143 = vmax.xlane.f32.xlu1 %v1142_v27  ;;  %1140 = vmax.xlane.f32.xlu0 %v1139_v28 }
  0xe5   : > { %v934_v31 = vpop.xlane.xlu1 %933  ;;  %v931_v32 = vpop.xlane.xlu0 %930 }
  0xe6   : > { %1307 = vst.msk [vmem:[%s2195_s16 + $0x28] sm:$0xff] %vm1301_vm1, %v934_v31  ;;  %1306 = vst.msk [vmem:[%s2195_s16 + $0x20] sm:$0xff] %vm1301_vm1, %v931_v32  ;;  %v888_v31 = vld [vmem:[#allocation2 + $0x318] sm:$0xff]  ;;  %v887_v32 = vld [vmem:[#allocation2 + $0x310] sm:$0xff] }
  0xe7   : > { %v1214_v35 = vsel %vm144_vm0, %v888_v31, -inf  ;;  %v1211_v36 = vsel %vm144_vm0, %v887_v32, -inf }
  0xe8   : > { %1149 = vmax.xlane.f32.xlu1 %v1148_v33  ;;  %1146 = vmax.xlane.f32.xlu0 %v1145_v34 }
  0xe9   : > { %v940_v37 = vpop.xlane.xlu1 %939  ;;  %v937_v38 = vpop.xlane.xlu0 %936 }
  0xea   : > { %1309 = vst.msk [vmem:[%s2195_s16 + $0x38] sm:$0xff] %vm1301_vm1, %v940_v37  ;;  %1308 = vst.msk [vmem:[%s2195_s16 + $0x30] sm:$0xff] %vm1301_vm1, %v937_v38  ;;  %v890_v37 = vld [vmem:[#allocation2 + $0x328] sm:$0xff]  ;;  %v889_v38 = vld [vmem:[#allocation2 + $0x320] sm:$0xff] }
  0xeb   : > { %v1220_v41 = vsel %vm144_vm0, %v890_v37, -inf  ;;  %v1217_v42 = vsel %vm144_vm0, %v889_v38, -inf }
  0xec   : > { %1155 = vmax.xlane.f32.xlu1 %v1154_v39  ;;  %1152 = vmax.xlane.f32.xlu0 %v1151_v40 }
  0xed   : > { %v946_v43 = vpop.xlane.xlu1 %945  ;;  %v943_v44 = vpop.xlane.xlu0 %942 }
  0xee   : > { %1311 = vst.msk [vmem:[%s2195_s16 + $0x48] sm:$0xff] %vm1301_vm1, %v946_v43  ;;  %1310 = vst.msk [vmem:[%s2195_s16 + $0x40] sm:$0xff] %vm1301_vm1, %v943_v44  ;;  %v892_v43 = vld [vmem:[#allocation2 + $0x338] sm:$0xff]  ;;  %v891_v44 = vld [vmem:[#allocation2 + $0x330] sm:$0xff] }
  0xef   : > { %v1226_v47 = vsel %vm144_vm0, %v892_v43, -inf  ;;  %v1223_v48 = vsel %vm144_vm0, %v891_v44, -inf }
  0xf0   : > { %1161 = vmax.xlane.f32.xlu1 %v1160_v45  ;;  %1158 = vmax.xlane.f32.xlu0 %v1157_v46 }
  0xf1   : > { %v952_v49 = vpop.xlane.xlu1 %951  ;;  %v949_v50 = vpop.xlane.xlu0 %948 }
  0xf2   : > { %1313 = vst.msk [vmem:[%s2195_s16 + $0x58] sm:$0xff] %vm1301_vm1, %v952_v49  ;;  %1312 = vst.msk [vmem:[%s2195_s16 + $0x50] sm:$0xff] %vm1301_vm1, %v949_v50  ;;  %v894_v49 = vld [vmem:[#allocation2 + $0x348] sm:$0xff]  ;;  %v893_v50 = vld [vmem:[#allocation2 + $0x340] sm:$0xff] }
  0xf3   : > { %v1232_v53 = vsel %vm144_vm0, %v894_v49, -inf  ;;  %v1229_v54 = vsel %vm144_vm0, %v893_v50, -inf }
  0xf4   : > { %1167 = vmax.xlane.f32.xlu1 %v1166_v51  ;;  %1164 = vmax.xlane.f32.xlu0 %v1163_v52 }
  0xf5   : > { %v958_v55 = vpop.xlane.xlu1 %957  ;;  %v955_v56 = vpop.xlane.xlu0 %954 }
  0xf6   : > { %1315 = vst.msk [vmem:[%s2195_s16 + $0x68] sm:$0xff] %vm1301_vm1, %v958_v55  ;;  %1314 = vst.msk [vmem:[%s2195_s16 + $0x60] sm:$0xff] %vm1301_vm1, %v955_v56  ;;  %v896_v55 = vld [vmem:[#allocation2 + $0x358] sm:$0xff]  ;;  %v895_v56 = vld [vmem:[#allocation2 + $0x350] sm:$0xff] }
  0xf7   : > { %v1238_v59 = vsel %vm144_vm0, %v896_v55, -inf  ;;  %v1235_v60 = vsel %vm144_vm0, %v895_v56, -inf }
  0xf8   : > { %1173 = vmax.xlane.f32.xlu1 %v1172_v57  ;;  %1170 = vmax.xlane.f32.xlu0 %v1169_v58 }
  0xf9   : > { %v964_v61 = vpop.xlane.xlu1 %963  ;;  %v961_v62 = vpop.xlane.xlu0 %960 }
  0xfa   : > { %1317 = vst.msk [vmem:[%s2195_s16 + $0x78] sm:$0xff] %vm1301_vm1, %v964_v61  ;;  %1316 = vst.msk [vmem:[%s2195_s16 + $0x70] sm:$0xff] %vm1301_vm1, %v961_v62  ;;  %v898_v61 = vld [vmem:[#allocation2 + $0x368] sm:$0xff]  ;;  %v897_v62 = vld [vmem:[#allocation2 + $0x360] sm:$0xff] }
  0xfb   : > { %v1244_v1 = vsel %vm144_vm0, %v898_v61, -inf  ;;  %v1241_v2 = vsel %vm144_vm0, %v897_v62, -inf }
  0xfc   : > { %1179 = vmax.xlane.f32.xlu1 %v1178_v63  ;;  %1176 = vmax.xlane.f32.xlu0 %v1175_v0 }
  0xfd   : > { %v970_v3 = vpop.xlane.xlu1 %969  ;;  %v967_v4 = vpop.xlane.xlu0 %966 }
  0xfe   : > { %1319 = vst.msk [vmem:[%s2195_s16 + $0x88] sm:$0xff] %vm1301_vm1, %v970_v3  ;;  %1318 = vst.msk [vmem:[%s2195_s16 + $0x80] sm:$0xff] %vm1301_vm1, %v967_v4  ;;  %v900_v3 = vld [vmem:[#allocation2 + $0x378] sm:$0xff]  ;;  %v899_v4 = vld [vmem:[#allocation2 + $0x370] sm:$0xff] }
  0xff   : > { %v1250_v7 = vsel %vm144_vm0, %v900_v3, -inf  ;;  %v1247_v8 = vsel %vm144_vm0, %v899_v4, -inf }
 0x100   : > { %1185 = vmax.xlane.f32.xlu1 %v1184_v5  ;;  %1182 = vmax.xlane.f32.xlu0 %v1181_v6 }
 0x101   : > { %v976_v9 = vpop.xlane.xlu1 %975  ;;  %v973_v10 = vpop.xlane.xlu0 %972 }
 0x102   : > { %1321 = vst.msk [vmem:[%s2195_s16 + $0x98] sm:$0xff] %vm1301_vm1, %v976_v9  ;;  %1320 = vst.msk [vmem:[%s2195_s16 + $0x90] sm:$0xff] %vm1301_vm1, %v973_v10  ;;  %v902_v9 = vld [vmem:[#allocation2 + $0x388] sm:$0xff]  ;;  %v901_v10 = vld [vmem:[#allocation2 + $0x380] sm:$0xff] }
 0x103   : > { %v1256_v13 = vsel %vm144_vm0, %v902_v9, -inf  ;;  %v1253_v14 = vsel %vm144_vm0, %v901_v10, -inf }
 0x104   : > { %1191 = vmax.xlane.f32.xlu1 %v1190_v11  ;;  %1188 = vmax.xlane.f32.xlu0 %v1187_v12 }
 0x105   : > { %v982_v15 = vpop.xlane.xlu1 %981  ;;  %v979_v16 = vpop.xlane.xlu0 %978 }
 0x106   : > { %1323 = vst.msk [vmem:[%s2195_s16 + $0xa8] sm:$0xff] %vm1301_vm1, %v982_v15  ;;  %1322 = vst.msk [vmem:[%s2195_s16 + $0xa0] sm:$0xff] %vm1301_vm1, %v979_v16  ;;  %v904_v15 = vld [vmem:[#allocation2 + $0x398] sm:$0xff]  ;;  %v903_v16 = vld [vmem:[#allocation2 + $0x390] sm:$0xff] }
 0x107   : > { %v1262_v19 = vsel %vm144_vm0, %v904_v15, -inf  ;;  %v1259_v20 = vsel %vm144_vm0, %v903_v16, -inf }
 0x108   : > { %1197 = vmax.xlane.f32.xlu1 %v1196_v17  ;;  %1194 = vmax.xlane.f32.xlu0 %v1193_v18 }
 0x109   : > { %v988_v21 = vpop.xlane.xlu1 %987  ;;  %v985_v22 = vpop.xlane.xlu0 %984 }
 0x10a   : > { %1325 = vst.msk [vmem:[%s2195_s16 + $0xb8] sm:$0xff] %vm1301_vm1, %v988_v21  ;;  %1324 = vst.msk [vmem:[%s2195_s16 + $0xb0] sm:$0xff] %vm1301_vm1, %v985_v22  ;;  %v906_v21 = vld [vmem:[#allocation2 + $0x3a8] sm:$0xff]  ;;  %v905_v22 = vld [vmem:[#allocation2 + $0x3a0] sm:$0xff] }
 0x10b   : > { %v1268_v25 = vsel %vm144_vm0, %v906_v21, -inf  ;;  %v1265_v26 = vsel %vm144_vm0, %v905_v22, -inf }
 0x10c   : > { %1203 = vmax.xlane.f32.xlu1 %v1202_v23  ;;  %1200 = vmax.xlane.f32.xlu0 %v1199_v24 }
 0x10d   : > { %v994_v27 = vpop.xlane.xlu1 %993  ;;  %v991_v28 = vpop.xlane.xlu0 %990 }
 0x10e   : > { %1327 = vst.msk [vmem:[%s2195_s16 + $0xc8] sm:$0xff] %vm1301_vm1, %v994_v27  ;;  %1326 = vst.msk [vmem:[%s2195_s16 + $0xc0] sm:$0xff] %vm1301_vm1, %v991_v28  ;;  %v908_v27 = vld [vmem:[#allocation2 + $0x3b8] sm:$0xff]  ;;  %v907_v28 = vld [vmem:[#allocation2 + $0x3b0] sm:$0xff] }
 0x10f   : > { %v1274_v31 = vsel %vm144_vm0, %v908_v27, -inf  ;;  %v1271_v32 = vsel %vm144_vm0, %v907_v28, -inf }
 0x110   : > { %1209 = vmax.xlane.f32.xlu1 %v1208_v29  ;;  %1206 = vmax.xlane.f32.xlu0 %v1205_v30 }
 0x111   : > { %v1000_v33 = vpop.xlane.xlu1 %999  ;;  %v997_v34 = vpop.xlane.xlu0 %996 }
 0x112   : > { %1329 = vst.msk [vmem:[%s2195_s16 + $0xd8] sm:$0xff] %vm1301_vm1, %v1000_v33  ;;  %1328 = vst.msk [vmem:[%s2195_s16 + $0xd0] sm:$0xff] %vm1301_vm1, %v997_v34  ;;  %v910_v33 = vld [vmem:[#allocation2 + $0x3c8] sm:$0xff]  ;;  %v909_v34 = vld [vmem:[#allocation2 + $0x3c0] sm:$0xff] }
 0x113   : > { %v1280_v37 = vsel %vm144_vm0, %v910_v33, -inf  ;;  %v1277_v38 = vsel %vm144_vm0, %v909_v34, -inf }
 0x114   : > { %1215 = vmax.xlane.f32.xlu1 %v1214_v35  ;;  %1212 = vmax.xlane.f32.xlu0 %v1211_v36 }
 0x115   : > { %v1006_v39 = vpop.xlane.xlu1 %1005  ;;  %v1003_v40 = vpop.xlane.xlu0 %1002 }
 0x116   : > { %1331 = vst.msk [vmem:[%s2195_s16 + $0xe8] sm:$0xff] %vm1301_vm1, %v1006_v39  ;;  %1330 = vst.msk [vmem:[%s2195_s16 + $0xe0] sm:$0xff] %vm1301_vm1, %v1003_v40  ;;  %v912_v39 = vld [vmem:[#allocation2 + $0x3d8] sm:$0xff]  ;;  %v911_v40 = vld [vmem:[#allocation2 + $0x3d0] sm:$0xff] }
 0x117   : > { %v1286_v43 = vsel %vm144_vm0, %v912_v39, -inf  ;;  %v1283_v44 = vsel %vm144_vm0, %v911_v40, -inf }
 0x118   : > { %1221 = vmax.xlane.f32.xlu1 %v1220_v41  ;;  %1218 = vmax.xlane.f32.xlu0 %v1217_v42 }
 0x119   : > { %v1012_v45 = vpop.xlane.xlu1 %1011  ;;  %v1009_v46 = vpop.xlane.xlu0 %1008 }
 0x11a   : > { %1333 = vst.msk [vmem:[%s2195_s16 + $0xf8] sm:$0xff] %vm1301_vm1, %v1012_v45  ;;  %1332 = vst.msk [vmem:[%s2195_s16 + $0xf0] sm:$0xff] %vm1301_vm1, %v1009_v46  ;;  %v914_v45 = vld [vmem:[#allocation2 + $0x3e8] sm:$0xff]  ;;  %v913_v46 = vld [vmem:[#allocation2 + $0x3e0] sm:$0xff] }
 0x11b   : > { %v1292_v49 = vsel %vm144_vm0, %v914_v45, -inf  ;;  %v1289_v50 = vsel %vm144_vm0, %v913_v46, -inf }
 0x11c   : > { %1227 = vmax.xlane.f32.xlu1 %v1226_v47  ;;  %1224 = vmax.xlane.f32.xlu0 %v1223_v48 }
 0x11d   : > { %v1018_v51 = vpop.xlane.xlu1 %1017  ;;  %v1015_v52 = vpop.xlane.xlu0 %1014 }
 0x11e   : > { %1335 = vst.msk [vmem:[%s2195_s16 + $0x108] sm:$0xff] %vm1301_vm1, %v1018_v51  ;;  %1334 = vst.msk [vmem:[%s2195_s16 + $0x100] sm:$0xff] %vm1301_vm1, %v1015_v52  ;;  %v916_v51 = vld [vmem:[#allocation2 + $0x3f8] sm:$0xff]  ;;  %v915_v52 = vld [vmem:[#allocation2 + $0x3f0] sm:$0xff] }
 0x11f   : > { %v1298_v55 = vsel %vm144_vm0, %v916_v51, -inf  ;;  %v1295_v56 = vsel %vm144_vm0, %v915_v52, -inf }
 0x120   : > { %1233 = vmax.xlane.f32.xlu1 %v1232_v53  ;;  %1230 = vmax.xlane.f32.xlu0 %v1229_v54 }
 0x121   : > { %v1024_v57 = vpop.xlane.xlu1 %1023  ;;  %v1021_v58 = vpop.xlane.xlu0 %1020 }
 0x122   : > { %1337 = vst.msk [vmem:[%s2195_s16 + $0x118] sm:$0xff] %vm1301_vm1, %v1024_v57  ;;  %1336 = vst.msk [vmem:[%s2195_s16 + $0x110] sm:$0xff] %vm1301_vm1, %v1021_v58 }
 0x124   : > { %1239 = vmax.xlane.f32.xlu1 %v1238_v59  ;;  %1236 = vmax.xlane.f32.xlu0 %v1235_v60 }
 0x125   : > { %v1030_v63 = vpop.xlane.xlu1 %1029  ;;  %v1027_v0 = vpop.xlane.xlu0 %1026 }
 0x126   : > { %1339 = vst.msk [vmem:[%s2195_s16 + $0x128] sm:$0xff] %vm1301_vm1, %v1030_v63  ;;  %1338 = vst.msk [vmem:[%s2195_s16 + $0x120] sm:$0xff] %vm1301_vm1, %v1027_v0 }
 0x128   : > { %1245 = vmax.xlane.f32.xlu1 %v1244_v1  ;;  %1242 = vmax.xlane.f32.xlu0 %v1241_v2 }
 0x129   : > { %v1036_v5 = vpop.xlane.xlu1 %1035  ;;  %v1033_v6 = vpop.xlane.xlu0 %1032 }
 0x12a   : > { %1341 = vst.msk [vmem:[%s2195_s16 + $0x138] sm:$0xff] %vm1301_vm1, %v1036_v5  ;;  %1340 = vst.msk [vmem:[%s2195_s16 + $0x130] sm:$0xff] %vm1301_vm1, %v1033_v6 }
 0x12c   : > { %1251 = vmax.xlane.f32.xlu1 %v1250_v7  ;;  %1248 = vmax.xlane.f32.xlu0 %v1247_v8 }
 0x12d   : > { %v1042_v11 = vpop.xlane.xlu1 %1041  ;;  %v1039_v12 = vpop.xlane.xlu0 %1038 }
 0x12e   : > { %1343 = vst.msk [vmem:[%s2195_s16 + $0x148] sm:$0xff] %vm1301_vm1, %v1042_v11  ;;  %1342 = vst.msk [vmem:[%s2195_s16 + $0x140] sm:$0xff] %vm1301_vm1, %v1039_v12 }
 0x130   : > { %1257 = vmax.xlane.f32.xlu1 %v1256_v13  ;;  %1254 = vmax.xlane.f32.xlu0 %v1253_v14 }
 0x131   : > { %v1048_v17 = vpop.xlane.xlu1 %1047  ;;  %v1045_v18 = vpop.xlane.xlu0 %1044 }
 0x132   : > { %1345 = vst.msk [vmem:[%s2195_s16 + $0x158] sm:$0xff] %vm1301_vm1, %v1048_v17  ;;  %1344 = vst.msk [vmem:[%s2195_s16 + $0x150] sm:$0xff] %vm1301_vm1, %v1045_v18 }
 0x134   : > { %1263 = vmax.xlane.f32.xlu1 %v1262_v19  ;;  %1260 = vmax.xlane.f32.xlu0 %v1259_v20 }
 0x135   : > { %v1054_v23 = vpop.xlane.xlu1 %1053  ;;  %v1051_v24 = vpop.xlane.xlu0 %1050 }
 0x136   : > { %1347 = vst.msk [vmem:[%s2195_s16 + $0x168] sm:$0xff] %vm1301_vm1, %v1054_v23  ;;  %1346 = vst.msk [vmem:[%s2195_s16 + $0x160] sm:$0xff] %vm1301_vm1, %v1051_v24 }
 0x138   : > { %1269 = vmax.xlane.f32.xlu1 %v1268_v25  ;;  %1266 = vmax.xlane.f32.xlu0 %v1265_v26 }
 0x139   : > { %v1060_v29 = vpop.xlane.xlu1 %1059  ;;  %v1057_v30 = vpop.xlane.xlu0 %1056 }
 0x13a   : > { %1349 = vst.msk [vmem:[%s2195_s16 + $0x178] sm:$0xff] %vm1301_vm1, %v1060_v29  ;;  %1348 = vst.msk [vmem:[%s2195_s16 + $0x170] sm:$0xff] %vm1301_vm1, %v1057_v30 }
 0x13c   : > { %1275 = vmax.xlane.f32.xlu1 %v1274_v31  ;;  %1272 = vmax.xlane.f32.xlu0 %v1271_v32 }
 0x13d   : > { %v1066_v35 = vpop.xlane.xlu1 %1065  ;;  %v1063_v36 = vpop.xlane.xlu0 %1062 }
 0x13e   : > { %1351 = vst.msk [vmem:[%s2195_s16 + $0x188] sm:$0xff] %vm1301_vm1, %v1066_v35  ;;  %1350 = vst.msk [vmem:[%s2195_s16 + $0x180] sm:$0xff] %vm1301_vm1, %v1063_v36 }
 0x140   : > { %1281 = vmax.xlane.f32.xlu1 %v1280_v37  ;;  %1278 = vmax.xlane.f32.xlu0 %v1277_v38 }
 0x141   : > { %v1072_v41 = vpop.xlane.xlu1 %1071  ;;  %v1069_v42 = vpop.xlane.xlu0 %1068 }
 0x142   : > { %1353 = vst.msk [vmem:[%s2195_s16 + $0x198] sm:$0xff] %vm1301_vm1, %v1072_v41  ;;  %1352 = vst.msk [vmem:[%s2195_s16 + $0x190] sm:$0xff] %vm1301_vm1, %v1069_v42 }
 0x144   : > { %1287 = vmax.xlane.f32.xlu1 %v1286_v43  ;;  %1284 = vmax.xlane.f32.xlu0 %v1283_v44 }
 0x145   : > { %v1078_v47 = vpop.xlane.xlu1 %1077  ;;  %v1075_v48 = vpop.xlane.xlu0 %1074 }
 0x146   : > { %1355 = vst.msk [vmem:[%s2195_s16 + $0x1a8] sm:$0xff] %vm1301_vm1, %v1078_v47  ;;  %1354 = vst.msk [vmem:[%s2195_s16 + $0x1a0] sm:$0xff] %vm1301_vm1, %v1075_v48 }
 0x148   : > { %1293 = vmax.xlane.f32.xlu1 %v1292_v49  ;;  %1290 = vmax.xlane.f32.xlu0 %v1289_v50 }
 0x149   : > { %v1084_v53 = vpop.xlane.xlu1 %1083  ;;  %v1081_v54 = vpop.xlane.xlu0 %1080 }
 0x14a   : > { %1357 = vst.msk [vmem:[%s2195_s16 + $0x1b8] sm:$0xff] %vm1301_vm1, %v1084_v53  ;;  %1356 = vst.msk [vmem:[%s2195_s16 + $0x1b0] sm:$0xff] %vm1301_vm1, %v1081_v54 }
 0x14c   : > { %1299 = vmax.xlane.f32.xlu1 %v1298_v55  ;;  %1296 = vmax.xlane.f32.xlu0 %v1295_v56 }
 0x14d   : > { %v1090_v57 = vpop.xlane.xlu1 %1089  ;;  %v1087_v58 = vpop.xlane.xlu0 %1086 }
 0x14e   : > { %1359 = vst.msk [vmem:[%s2195_s16 + $0x1c8] sm:$0xff] %vm1301_vm1, %v1090_v57  ;;  %1358 = vst.msk [vmem:[%s2195_s16 + $0x1c0] sm:$0xff] %vm1301_vm1, %v1087_v58 }
 0x151   : > { %v1096_v59 = vpop.xlane.xlu1 %1095  ;;  %v1093_v60 = vpop.xlane.xlu0 %1092 }
 0x152   : > { %1361 = vst.msk [vmem:[%s2195_s16 + $0x1d8] sm:$0xff] %vm1301_vm1, %v1096_v59  ;;  %1360 = vst.msk [vmem:[%s2195_s16 + $0x1d0] sm:$0xff] %vm1301_vm1, %v1093_v60 }
 0x155   : > { %v1102_v61 = vpop.xlane.xlu1 %1101  ;;  %v1099_v62 = vpop.xlane.xlu0 %1098 }
 0x156   : > { %1363 = vst.msk [vmem:[%s2195_s16 + $0x1e8] sm:$0xff] %vm1301_vm1, %v1102_v61  ;;  %1362 = vst.msk [vmem:[%s2195_s16 + $0x1e0] sm:$0xff] %vm1301_vm1, %v1099_v62 }
 0x159   : > { %v1108_v63 = vpop.xlane.xlu1 %1107  ;;  %v1105_v0 = vpop.xlane.xlu0 %1104 }
 0x15a   : > { %1365 = vst.msk [vmem:[%s2195_s16 + $0x1f8] sm:$0xff] %vm1301_vm1, %v1108_v63  ;;  %1364 = vst.msk [vmem:[%s2195_s16 + $0x1f0] sm:$0xff] %vm1301_vm1, %v1105_v0 }
 0x15d   : > { %v1114_v1 = vpop.xlane.xlu1 %1113  ;;  %v1111_v2 = vpop.xlane.xlu0 %1110 }
 0x15e   : > { %1367 = vst.msk [vmem:[%s2195_s16 + $0x208] sm:$0xff] %vm1301_vm1, %v1114_v1  ;;  %1366 = vst.msk [vmem:[%s2195_s16 + $0x200] sm:$0xff] %vm1301_vm1, %v1111_v2 }
 0x161   : > { %v1120_v3 = vpop.xlane.xlu1 %1119  ;;  %v1117_v4 = vpop.xlane.xlu0 %1116 }
 0x162   : > { %1369 = vst.msk [vmem:[%s2195_s16 + $0x218] sm:$0xff] %vm1301_vm1, %v1120_v3  ;;  %1368 = vst.msk [vmem:[%s2195_s16 + $0x210] sm:$0xff] %vm1301_vm1, %v1117_v4 }
 0x165   : > { %v1126_v5 = vpop.xlane.xlu1 %1125  ;;  %v1123_v6 = vpop.xlane.xlu0 %1122 }
 0x166   : > { %1371 = vst.msk [vmem:[%s2195_s16 + $0x228] sm:$0xff] %vm1301_vm1, %v1126_v5  ;;  %1370 = vst.msk [vmem:[%s2195_s16 + $0x220] sm:$0xff] %vm1301_vm1, %v1123_v6 }
 0x169   : > { %v1132_v7 = vpop.xlane.xlu1 %1131  ;;  %v1129_v8 = vpop.xlane.xlu0 %1128 }
 0x16a   : > { %1373 = vst.msk [vmem:[%s2195_s16 + $0x238] sm:$0xff] %vm1301_vm1, %v1132_v7  ;;  %1372 = vst.msk [vmem:[%s2195_s16 + $0x230] sm:$0xff] %vm1301_vm1, %v1129_v8 }
 0x16d   : > { %v1138_v9 = vpop.xlane.xlu1 %1137  ;;  %v1135_v10 = vpop.xlane.xlu0 %1134 }
 0x16e   : > { %1375 = vst.msk [vmem:[%s2195_s16 + $0x248] sm:$0xff] %vm1301_vm1, %v1138_v9  ;;  %1374 = vst.msk [vmem:[%s2195_s16 + $0x240] sm:$0xff] %vm1301_vm1, %v1135_v10 }
 0x171   : > { %v1144_v11 = vpop.xlane.xlu1 %1143  ;;  %v1141_v12 = vpop.xlane.xlu0 %1140 }
 0x172   : > { %1377 = vst.msk [vmem:[%s2195_s16 + $0x258] sm:$0xff] %vm1301_vm1, %v1144_v11  ;;  %1376 = vst.msk [vmem:[%s2195_s16 + $0x250] sm:$0xff] %vm1301_vm1, %v1141_v12 }
 0x175   : > { %v1150_v13 = vpop.xlane.xlu1 %1149  ;;  %v1147_v14 = vpop.xlane.xlu0 %1146 }
 0x176   : > { %1379 = vst.msk [vmem:[%s2195_s16 + $0x268] sm:$0xff] %vm1301_vm1, %v1150_v13  ;;  %1378 = vst.msk [vmem:[%s2195_s16 + $0x260] sm:$0xff] %vm1301_vm1, %v1147_v14 }
 0x179   : > { %v1156_v15 = vpop.xlane.xlu1 %1155  ;;  %v1153_v16 = vpop.xlane.xlu0 %1152 }
 0x17a   : > { %1381 = vst.msk [vmem:[%s2195_s16 + $0x278] sm:$0xff] %vm1301_vm1, %v1156_v15  ;;  %1380 = vst.msk [vmem:[%s2195_s16 + $0x270] sm:$0xff] %vm1301_vm1, %v1153_v16 }
 0x17d   : > { %v1162_v17 = vpop.xlane.xlu1 %1161  ;;  %v1159_v18 = vpop.xlane.xlu0 %1158 }
 0x17e   : > { %1383 = vst.msk [vmem:[%s2195_s16 + $0x288] sm:$0xff] %vm1301_vm1, %v1162_v17  ;;  %1382 = vst.msk [vmem:[%s2195_s16 + $0x280] sm:$0xff] %vm1301_vm1, %v1159_v18 }
 0x181   : > { %v1168_v19 = vpop.xlane.xlu1 %1167  ;;  %v1165_v20 = vpop.xlane.xlu0 %1164 }
 0x182   : > { %1385 = vst.msk [vmem:[%s2195_s16 + $0x298] sm:$0xff] %vm1301_vm1, %v1168_v19  ;;  %1384 = vst.msk [vmem:[%s2195_s16 + $0x290] sm:$0xff] %vm1301_vm1, %v1165_v20 }
 0x185   : > { %v1174_v21 = vpop.xlane.xlu1 %1173  ;;  %v1171_v22 = vpop.xlane.xlu0 %1170 }
 0x186   : > { %1387 = vst.msk [vmem:[%s2195_s16 + $0x2a8] sm:$0xff] %vm1301_vm1, %v1174_v21  ;;  %1386 = vst.msk [vmem:[%s2195_s16 + $0x2a0] sm:$0xff] %vm1301_vm1, %v1171_v22 }
 0x189   : > { %v1180_v23 = vpop.xlane.xlu1 %1179  ;;  %v1177_v24 = vpop.xlane.xlu0 %1176 }
 0x18a   : > { %1389 = vst.msk [vmem:[%s2195_s16 + $0x2b8] sm:$0xff] %vm1301_vm1, %v1180_v23  ;;  %1388 = vst.msk [vmem:[%s2195_s16 + $0x2b0] sm:$0xff] %vm1301_vm1, %v1177_v24 }
 0x18d   : > { %v1186_v25 = vpop.xlane.xlu1 %1185  ;;  %v1183_v26 = vpop.xlane.xlu0 %1182 }
 0x18e   : > { %1391 = vst.msk [vmem:[%s2195_s16 + $0x2c8] sm:$0xff] %vm1301_vm1, %v1186_v25  ;;  %1390 = vst.msk [vmem:[%s2195_s16 + $0x2c0] sm:$0xff] %vm1301_vm1, %v1183_v26 }
 0x191   : > { %v1192_v27 = vpop.xlane.xlu1 %1191  ;;  %v1189_v28 = vpop.xlane.xlu0 %1188 }
 0x192   : > { %1393 = vst.msk [vmem:[%s2195_s16 + $0x2d8] sm:$0xff] %vm1301_vm1, %v1192_v27  ;;  %1392 = vst.msk [vmem:[%s2195_s16 + $0x2d0] sm:$0xff] %vm1301_vm1, %v1189_v28 }
 0x195   : > { %v1198_v29 = vpop.xlane.xlu1 %1197  ;;  %v1195_v30 = vpop.xlane.xlu0 %1194 }
 0x196   : > { %1395 = vst.msk [vmem:[%s2195_s16 + $0x2e8] sm:$0xff] %vm1301_vm1, %v1198_v29  ;;  %1394 = vst.msk [vmem:[%s2195_s16 + $0x2e0] sm:$0xff] %vm1301_vm1, %v1195_v30 }
 0x199   : > { %v1204_v31 = vpop.xlane.xlu1 %1203  ;;  %v1201_v32 = vpop.xlane.xlu0 %1200 }
 0x19a   : > { %1397 = vst.msk [vmem:[%s2195_s16 + $0x2f8] sm:$0xff] %vm1301_vm1, %v1204_v31  ;;  %1396 = vst.msk [vmem:[%s2195_s16 + $0x2f0] sm:$0xff] %vm1301_vm1, %v1201_v32 }
 0x19d   : > { %v1210_v33 = vpop.xlane.xlu1 %1209  ;;  %v1207_v34 = vpop.xlane.xlu0 %1206 }
 0x19e   : > { %1399 = vst.msk [vmem:[%s2195_s16 + $0x308] sm:$0xff] %vm1301_vm1, %v1210_v33  ;;  %1398 = vst.msk [vmem:[%s2195_s16 + $0x300] sm:$0xff] %vm1301_vm1, %v1207_v34 }
 0x1a1   : > { %v1216_v35 = vpop.xlane.xlu1 %1215  ;;  %v1213_v36 = vpop.xlane.xlu0 %1212 }
 0x1a2   : > { %1401 = vst.msk [vmem:[%s2195_s16 + $0x318] sm:$0xff] %vm1301_vm1, %v1216_v35  ;;  %1400 = vst.msk [vmem:[%s2195_s16 + $0x310] sm:$0xff] %vm1301_vm1, %v1213_v36 }
 0x1a5   : > { %v1222_v37 = vpop.xlane.xlu1 %1221  ;;  %v1219_v38 = vpop.xlane.xlu0 %1218 }
 0x1a6   : > { %1403 = vst.msk [vmem:[%s2195_s16 + $0x328] sm:$0xff] %vm1301_vm1, %v1222_v37  ;;  %1402 = vst.msk [vmem:[%s2195_s16 + $0x320] sm:$0xff] %vm1301_vm1, %v1219_v38 }
 0x1a9   : > { %v1228_v39 = vpop.xlane.xlu1 %1227  ;;  %v1225_v40 = vpop.xlane.xlu0 %1224 }
 0x1aa   : > { %1405 = vst.msk [vmem:[%s2195_s16 + $0x338] sm:$0xff] %vm1301_vm1, %v1228_v39  ;;  %1404 = vst.msk [vmem:[%s2195_s16 + $0x330] sm:$0xff] %vm1301_vm1, %v1225_v40 }
 0x1ad   : > { %v1234_v41 = vpop.xlane.xlu1 %1233  ;;  %v1231_v42 = vpop.xlane.xlu0 %1230 }
 0x1ae   : > { %1407 = vst.msk [vmem:[%s2195_s16 + $0x348] sm:$0xff] %vm1301_vm1, %v1234_v41  ;;  %1406 = vst.msk [vmem:[%s2195_s16 + $0x340] sm:$0xff] %vm1301_vm1, %v1231_v42 }
 0x1b1   : > { %v1240_v43 = vpop.xlane.xlu1 %1239  ;;  %v1237_v44 = vpop.xlane.xlu0 %1236 }
 0x1b2   : > { %1409 = vst.msk [vmem:[%s2195_s16 + $0x358] sm:$0xff] %vm1301_vm1, %v1240_v43  ;;  %1408 = vst.msk [vmem:[%s2195_s16 + $0x350] sm:$0xff] %vm1301_vm1, %v1237_v44 }
 0x1b5   : > { %v1246_v45 = vpop.xlane.xlu1 %1245  ;;  %v1243_v46 = vpop.xlane.xlu0 %1242 }
 0x1b6   : > { %1411 = vst.msk [vmem:[%s2195_s16 + $0x368] sm:$0xff] %vm1301_vm1, %v1246_v45  ;;  %1410 = vst.msk [vmem:[%s2195_s16 + $0x360] sm:$0xff] %vm1301_vm1, %v1243_v46 }
 0x1b9   : > { %v1252_v47 = vpop.xlane.xlu1 %1251  ;;  %v1249_v48 = vpop.xlane.xlu0 %1248 }
 0x1ba   : > { %1413 = vst.msk [vmem:[%s2195_s16 + $0x378] sm:$0xff] %vm1301_vm1, %v1252_v47  ;;  %1412 = vst.msk [vmem:[%s2195_s16 + $0x370] sm:$0xff] %vm1301_vm1, %v1249_v48 }
 0x1bd   : > { %v1258_v49 = vpop.xlane.xlu1 %1257  ;;  %v1255_v50 = vpop.xlane.xlu0 %1254 }
 0x1be   : > { %1415 = vst.msk [vmem:[%s2195_s16 + $0x388] sm:$0xff] %vm1301_vm1, %v1258_v49  ;;  %1414 = vst.msk [vmem:[%s2195_s16 + $0x380] sm:$0xff] %vm1301_vm1, %v1255_v50 }
 0x1c1   : > { %v1264_v51 = vpop.xlane.xlu1 %1263  ;;  %v1261_v52 = vpop.xlane.xlu0 %1260 }
 0x1c2   : > { %1417 = vst.msk [vmem:[%s2195_s16 + $0x398] sm:$0xff] %vm1301_vm1, %v1264_v51  ;;  %1416 = vst.msk [vmem:[%s2195_s16 + $0x390] sm:$0xff] %vm1301_vm1, %v1261_v52 }
 0x1c5   : > { %v1270_v53 = vpop.xlane.xlu1 %1269  ;;  %v1267_v54 = vpop.xlane.xlu0 %1266 }
 0x1c6   : > { %1419 = vst.msk [vmem:[%s2195_s16 + $0x3a8] sm:$0xff] %vm1301_vm1, %v1270_v53  ;;  %1418 = vst.msk [vmem:[%s2195_s16 + $0x3a0] sm:$0xff] %vm1301_vm1, %v1267_v54 }
 0x1c9   : > { %v1276_v55 = vpop.xlane.xlu1 %1275  ;;  %v1273_v56 = vpop.xlane.xlu0 %1272 }
 0x1ca   : > { %1421 = vst.msk [vmem:[%s2195_s16 + $0x3b8] sm:$0xff] %vm1301_vm1, %v1276_v55  ;;  %1420 = vst.msk [vmem:[%s2195_s16 + $0x3b0] sm:$0xff] %vm1301_vm1, %v1273_v56 }
 0x1cd   : > { %v1282_v57 = vpop.xlane.xlu1 %1281  ;;  %v1279_v58 = vpop.xlane.xlu0 %1278 }
 0x1ce   : > { %1423 = vst.msk [vmem:[%s2195_s16 + $0x3c8] sm:$0xff] %vm1301_vm1, %v1282_v57  ;;  %1422 = vst.msk [vmem:[%s2195_s16 + $0x3c0] sm:$0xff] %vm1301_vm1, %v1279_v58 }
 0x1d1   : > { %v1288_v59 = vpop.xlane.xlu1 %1287  ;;  %v1285_v60 = vpop.xlane.xlu0 %1284 }
 0x1d2   : > { %1425 = vst.msk [vmem:[%s2195_s16 + $0x3d8] sm:$0xff] %vm1301_vm1, %v1288_v59  ;;  %1424 = vst.msk [vmem:[%s2195_s16 + $0x3d0] sm:$0xff] %vm1301_vm1, %v1285_v60 }
 0x1d5   : > { %v1294_v61 = vpop.xlane.xlu1 %1293  ;;  %v1291_v62 = vpop.xlane.xlu0 %1290 }
 0x1d6   : > { %1427 = vst.msk [vmem:[%s2195_s16 + $0x3e8] sm:$0xff] %vm1301_vm1, %v1294_v61  ;;  %1426 = vst.msk [vmem:[%s2195_s16 + $0x3e0] sm:$0xff] %vm1301_vm1, %v1291_v62 }
 0x1d9   : > { %v1300_v63 = vpop.xlane.xlu1 %1299  ;;  %v1297_v0 = vpop.xlane.xlu0 %1296 }
 0x1da   : > { %1429 = vst.msk [vmem:[%s2195_s16 + $0x3f8] sm:$0xff] %vm1301_vm1, %v1300_v63  ;;  %1428 = vst.msk [vmem:[%s2195_s16 + $0x3f0] sm:$0xff] %vm1301_vm1, %v1297_v0 }
 0x1db PF: > { %s11_s8 = sadd.s32 1, %s1559_s8   ;;  %s2520_s6 = smov %s1555_s7 }
 0x1dc   : > { %p8_p5 = scmp.ge.s32.totalorder %s11_s8, 4   ;;  %s2521_s7 = smov %s2523_s9 }
 0x1de   :  { %10 = sbr.rel (!%p8_p5) target bundleno = 2 (0x2), region = 62 }

</bundles_post_ra>
